<compile_context>
chip_gen: v7x
topology: tpu7x:2x2x1
jax: 0.10.0
libtpu: 0.0.40
codegen_flags: <defaults>
</compile_context>

<pallas_src>
import functools

import jax
import jax.numpy as jnp
from jax import lax
from jax.experimental import pallas as pl
from jax.experimental.pallas import tpu as pltpu

_POOLING_SIZE = 16
_WELL_EXPOSED_LEVEL = 0.6


def _sum_all(x):
    """Reduce a 2-D tile to a (1, 1) array using keepdims reductions only."""
    return jnp.sum(jnp.sum(x, axis=1, keepdims=True), axis=0, keepdims=True)


def _diag_mats(n, dtype):
    """Identity / super-diagonal / sub-diagonal (n, n) matrices (in-kernel)."""
    i = lax.broadcasted_iota(jnp.int32, (n, n), 0)
    j = lax.broadcasted_iota(jnp.int32, (n, n), 1)
    eye = (i == j).astype(dtype)
    sup = ((i + 1) == j).astype(dtype)   # ones at (k, k+1)
    sub = (i == (j + 1)).astype(dtype)   # ones at (k+1, k)
    return eye, sup, sub


def _pool_mats(h, w, pool, hp, wp, dtype):
    """Block-average pooling matrices (hp, h) and (w, wp), floor behavior."""
    inv = 1.0 / float(pool)
    ih = lax.broadcasted_iota(jnp.int32, (hp, h), 0)
    jh = lax.broadcasted_iota(jnp.int32, (hp, h), 1)
    ph = ((jh >= ih * pool) & (jh < (ih + 1) * pool)).astype(dtype) * inv
    iw = lax.broadcasted_iota(jnp.int32, (w, wp), 0)
    jw = lax.broadcasted_iota(jnp.int32, (w, wp), 1)
    pw = ((iw >= jw * pool) & (iw < (jw + 1) * pool)).astype(dtype) * inv
    return ph, pw


def _zero_reference_loss_kernel(
    enh_ref, org_ref, alpha_ref,
    total_ref, exp_ref, col_ref, spa_ref, ilm_ref,
    *, batch, pool, well_exposed, w_exp, w_col, w_spa, w_ilm):
    f32 = jnp.float32
    b = pl.program_id(0)

    @pl.when(b == 0)
    def _init():
        total_ref[...] = jnp.zeros_like(total_ref)
        exp_ref[...] = jnp.zeros_like(exp_ref)
        col_ref[...] = jnp.zeros_like(col_ref)
        spa_ref[...] = jnp.zeros_like(spa_ref)
        ilm_ref[...] = jnp.zeros_like(ilm_ref)

    C, H, W = enh_ref.shape
    Ca, Ha, Wa = alpha_ref.shape
    hp, wp = H // pool, W // pool

    # ---- Load enhanced / original channels (native-dtype DMA, cast in-kernel).
    e_ch = [enh_ref[c].astype(f32) for c in range(C)]
    o_ch = [org_ref[c].astype(f32) for c in range(C)]

    # ---- Color constancy (on the enhanced image; C == 3).
    inv_hw = 1.0 / float(H * W)
    r_m = _sum_all(e_ch[0]) * inv_hw
    g_m = _sum_all(e_ch[1]) * inv_hw
    b_m = _sum_all(e_ch[2]) * inv_hw
    rg = r_m - g_m
    rb = r_m - b_m
    gb = g_m - b_m
    col_ref[...] += rg * rg + rb * rb + gb * gb

    # ---- Channel-mean maps and pool x pool average pooling as two matmuls.
    inv_c = 1.0 / float(C)
    m_e = e_ch[0]
    m_o = o_ch[0]
    for c in range(1, C):
        m_e = m_e + e_ch[c]
        m_o = m_o + o_ch[c]
    m_e = m_e * inv_c
    m_o = m_o * inv_c

    ph, pw = _pool_mats(H, W, pool, hp, wp, f32)     # (hp, H), (W, wp)
    pooled_e = jnp.dot(jnp.dot(ph, m_e, preferred_element_type=f32), pw,
                       preferred_element_type=f32)
    pooled_o = jnp.dot(jnp.dot(ph, m_o, preferred_element_type=f32), pw,
                       preferred_element_type=f32)

    # ---- Exposure control: sum |pooled - 0.6|.
    exp_ref[...] += _sum_all(jnp.abs(pooled_e - well_exposed))

    # ---- Spatial consistency: zero-padded neighbour diffs of
    #      d = pooled_enh - pooled_orig, via (I - shift) matmuls
    #      (conv is linear, so diff-of-convs == conv-of-diff).
    d = pooled_e - pooled_o
    eye_h, sup_h, sub_h = _diag_mats(hp, f32)
    eye_w, sup_w, sub_w = _diag_mats(wp, f32)
    dl = jnp.dot(d, eye_w - sup_w, preferred_element_type=f32)  # d[i,j]-d[i,j-1]
    dr = jnp.dot(d, eye_w - sub_w, preferred_element_type=f32)  # d[i,j]-d[i,j+1]
    dt = jnp.dot(eye_h - sub_h, d, preferred_element_type=f32)  # d[i,j]-d[i-1,j]
    dd = jnp.dot(eye_h - sup_h, d, preferred_element_type=f32)  # d[i,j]-d[i+1,j]
    spa_ref[...] += _sum_all(dl * dl + dr * dr + dt * dt + dd * dd)

    # ---- Illumination smoothness (total variation) on the alpha maps.
    i_h = lax.broadcasted_iota(jnp.int32, (Ha, Ha), 0)
    j_h = lax.broadcasted_iota(jnp.int32, (Ha, Ha), 1)
    # (row_diff @ a)[i, :] = a[i, :] - a[i-1, :] for i >= 1, zero for i == 0
    row_diff = (((i_h == j_h) & (i_h >= 1)).astype(f32)
                - (i_h == (j_h + 1)).astype(f32))
    i_w = lax.broadcasted_iota(jnp.int32, (Wa, Wa), 0)
    j_w = lax.broadcasted_iota(jnp.int32, (Wa, Wa), 1)
    # (a @ col_diff)[:, j] = a[:, j] - a[:, j-1] for j >= 1, zero for j == 0
    col_diff = (((i_w == j_w) & (j_w >= 1)).astype(f32)
                - ((i_w + 1) == j_w).astype(f32))

    inv_count_h = 1.0 / float((Ha - 1) * Wa)
    inv_count_w = 1.0 / float(Ha * (Wa - 1))
    tv = jnp.zeros((1, 1), f32)
    for c in range(Ca):
        a_c = alpha_ref[c].astype(f32)
        hd = jnp.dot(row_diff, a_c, preferred_element_type=f32)
        wd = jnp.dot(a_c, col_diff, preferred_element_type=f32)
        tv = tv + _sum_all(hd * hd) * inv_count_h + _sum_all(wd * wd) * inv_count_w
    ilm_ref[...] += tv

    # ---- Finalize on the last batch step: weights + batch-mean normalizers.
    @pl.when(b == batch - 1)
    def _finalize():
        inv_b = 1.0 / float(batch)
        inv_patches = 1.0 / float(hp * wp)
        loss_exp = exp_ref[...] * (w_exp * inv_b * inv_patches)
        loss_col = col_ref[...] * (w_col * inv_b)
        loss_spa = spa_ref[...] * (w_spa * inv_b * inv_patches)
        loss_ilm = ilm_ref[...] * (w_ilm * inv_b)
        exp_ref[...] = loss_exp
        col_ref[...] = loss_col
        spa_ref[...] = loss_spa
        ilm_ref[...] = loss_ilm
        total_ref[...] = loss_exp + loss_spa + loss_col + loss_ilm


def zero_reference_loss(enhanced_images, orig_images, alpha_maps, *,
                        loss_exp_weight=1.0, loss_col_weight=0.5,
                        loss_spa_weight=1.0, loss_ilm_weight=20.0):
    """Equivalent of ZeroReferenceLoss.forward -> (total, per-loss dict)."""
    B, C, H, W = enhanced_images.shape
    assert orig_images.shape == (B, C, H, W)
    assert C == 3, "ColorConstancyLoss requires 3 channels"
    Ba, Ca, Ha, Wa = alpha_maps.shape
    assert Ba == B

    kernel = functools.partial(
        _zero_reference_loss_kernel,
        batch=B,
        pool=_POOLING_SIZE,
        well_exposed=float(_WELL_EXPOSED_LEVEL),
        w_exp=float(loss_exp_weight),
        w_col=float(loss_col_weight),
        w_spa=float(loss_spa_weight),
        w_ilm=float(loss_ilm_weight))

    scalar_out = jax.ShapeDtypeStruct((1, 1), jnp.float32)
    total, l_exp, l_col, l_spa, l_ilm = pl.pallas_call(
        kernel,
        out_shape=(scalar_out,) * 5,
        grid=(B,),
        in_specs=[
            pl.BlockSpec((None, C, H, W), lambda b: (b, 0, 0, 0)),     # enhanced
            pl.BlockSpec((None, C, H, W), lambda b: (b, 0, 0, 0)),     # original
            pl.BlockSpec((None, Ca, Ha, Wa), lambda b: (b, 0, 0, 0)),  # alpha maps
        ],
        out_specs=[pl.BlockSpec((1, 1), lambda b: (0, 0)) for _ in range(5)],
        compiler_params=pltpu.CompilerParams(
            dimension_semantics=("arbitrary",)),   # batch axis is a reduction
    )(enhanced_images, orig_images, alpha_maps)

    total = total[0, 0]
    # Note: the PyTorch reference builds the dict with `Cls.__class__.__name__`
    # (which is the string 'type'); we use readable class names instead.
    losses = {
        "ZeroReferenceLoss": total,
        "ExposureControlLoss": l_exp[0, 0],
        "ColorConstancyLoss": l_col[0, 0],
        "SpatialConsistencyLoss": l_spa[0, 0],
        "IlluminationSmoothnessLoss": l_ilm[0, 0],
    }
    return total, losses


def _reference_zero_reference_loss(enhanced, orig, alpha,
                                   loss_exp_weight=1.0, loss_col_weight=0.5,
                                   loss_spa_weight=1.0, loss_ilm_weight=20.0):
    """Pure-JAX mirror of the PyTorch module, for correctness checking."""
    pool = _POOLING_SIZE
    B, C, H, W = enhanced.shape
    hp, wp = H // pool, W // pool

    def channel_mean_pool(x):
        red = jnp.mean(x, axis=1, keepdims=True)
        red = red[:, :, :hp * pool, :wp * pool]
        return red.reshape(B, 1, hp, pool, wp, pool).mean(axis=(3, 5))

    # Exposure control
    pooled_e = channel_mean_pool(enhanced)
    loss_exp = jnp.mean(jnp.mean(jnp.abs(pooled_e - _WELL_EXPOSED_LEVEL),
                                 axis=(2, 3)))

    # Color constancy
    mpc = jnp.mean(enhanced, axis=(2, 3))
    r, g, bch = mpc[:, 0], mpc[:, 1], mpc[:, 2]
    loss_col = jnp.mean((r - g) ** 2 + (r - bch) ** 2 + (g - bch) ** 2)

    # Spatial consistency
    def patch_diffs(p):
        pz = jnp.pad(p, ((0, 0), (0, 0), (1, 1), (1, 1)))
        left = p - pz[:, :, 1:-1, :-2]
        right = p - pz[:, :, 1:-1, 2:]
        top = p - pz[:, :, :-2, 1:-1]
        down = p - pz[:, :, 2:, 1:-1]
        return top, down, left, right

    pooled_o = channel_mean_pool(orig)
    t1, d1, l1, r1 = patch_diffs(pooled_e)
    t2, d2, l2, r2 = patch_diffs(pooled_o)
    loss_spa = jnp.mean(jnp.mean((l1 - l2) ** 2 + (r1 - r2) ** 2
                                 + (t1 - t2) ** 2 + (d1 - d2) ** 2, axis=(2, 3)))

    # Illumination smoothness
    Ba, Ca, Ha, Wa = alpha.shape
    count_h = (Ha - 1) * Wa
    count_w = Ha * (Wa - 1)
    h_tv = jnp.sum(jnp.square(alpha[:, :, 1:, :] - alpha[:, :, :-1, :]))
    w_tv = jnp.sum(jnp.square(alpha[:, :, :, 1:] - alpha[:, :, :, :-1]))
    loss_ilm = (h_tv / count_h + w_tv / count_w) / Ba

    loss_exp = loss_exp_weight * loss_exp
    loss_col = loss_col_weight * loss_col
    loss_spa = loss_spa_weight * loss_spa
    loss_ilm = loss_ilm_weight * loss_ilm
    total = loss_exp + loss_spa + loss_col + loss_ilm
    return total, {
        "ZeroReferenceLoss": total,
        "ExposureControlLoss": loss_exp,
        "ColorConstancyLoss": loss_col,
        "SpatialConsistencyLoss": loss_spa,
        "IlluminationSmoothnessLoss": loss_ilm,
    }


if __name__ == "__main__":
    key = jax.random.PRNGKey(0)
    k1, k2, k3 = jax.random.split(key, 3)
    # Small NCHW inputs: batch=2, 3 channels, 32x32 spatial (pooling size is 16).
    enhanced = jax.random.uniform(k1, (2, 3, 32, 32), dtype=jnp.float32)
    orig = jax.random.uniform(k2, (2, 3, 32, 32), dtype=jnp.float32)
    alpha = jax.random.uniform(k3, (2, 3, 32, 32), dtype=jnp.float32,
                               minval=-1.0, maxval=1.0)

    total, parts = zero_reference_loss(enhanced, orig, alpha)
    total = jax.block_until_ready(total)

    ref_total, ref_parts = _reference_zero_reference_loss(enhanced, orig, alpha)

    assert jnp.allclose(total, ref_total, atol=1e-4, rtol=1e-4), (total, ref_total)
    for name in ("ExposureControlLoss", "ColorConstancyLoss",
                 "SpatialConsistencyLoss", "IlluminationSmoothnessLoss"):
        assert jnp.allclose(parts[name], ref_parts[name], atol=1e-4, rtol=1e-4), (
            name, parts[name], ref_parts[name])

    print("KERNEL_OK")
</pallas_src>

<mosaic_0001>
module attributes {stable_mosaic.version = 11 : i64} {
  func.func @_zero_reference_loss_kernel(%arg0: i32, %arg1: memref<1x3x32x32xf32, #tpu.memory_space<vmem>>, %arg2: memref<1x3x32x32xf32, #tpu.memory_space<vmem>>, %arg3: memref<1x3x32x32xf32, #tpu.memory_space<vmem>>, %arg4: memref<1x1xf32, #tpu.memory_space<vmem>>, %arg5: memref<1x1xf32, #tpu.memory_space<vmem>>, %arg6: memref<1x1xf32, #tpu.memory_space<vmem>>, %arg7: memref<1x1xf32, #tpu.memory_space<vmem>>, %arg8: memref<1x1xf32, #tpu.memory_space<vmem>>) attributes {dimension_semantics = [#tpu.dimension_semantics<arbitrary>], iteration_bounds = array<i64: 2>, scalar_prefetch = 0 : i64, scratch_operands = 0 : i64, tpu.core_type = #tpu.core_type<tc>, window_params = [{transform_indices = @transform_0, window_bounds = array<i64: 1, 3, 32, 32>}, {transform_indices = @transform_1, window_bounds = array<i64: 1, 3, 32, 32>}, {transform_indices = @transform_2, window_bounds = array<i64: 1, 3, 32, 32>}, {pipeline_mode = #tpu.pipeline_mode<synchronous>, transform_indices = @transform_3, window_bounds = array<i64: 1, 1>}, {pipeline_mode = #tpu.pipeline_mode<synchronous>, transform_indices = @transform_4, window_bounds = array<i64: 1, 1>}, {pipeline_mode = #tpu.pipeline_mode<synchronous>, transform_indices = @transform_5, window_bounds = array<i64: 1, 1>}, {pipeline_mode = #tpu.pipeline_mode<synchronous>, transform_indices = @transform_6, window_bounds = array<i64: 1, 1>}, {pipeline_mode = #tpu.pipeline_mode<synchronous>, transform_indices = @transform_7, window_bounds = array<i64: 1, 1>}]} {
    %c0_i32 = arith.constant 0 : i32
    %0 = arith.cmpi eq, %arg0, %c0_i32 : i32
    %1 = arith.extui %0 : i1 to i32
    %c0_i32_0 = arith.constant 0 : i32
    %2 = arith.cmpi ne, %1, %c0_i32_0 : i32
    scf.if %2 {
      %cst_114 = arith.constant 0.000000e+00 : f32
      %244 = vector.broadcast %cst_114 : f32 to vector<1x1xf32>
      %c0_115 = arith.constant 0 : index
      %c0_116 = arith.constant 0 : index
      %245 = vector.load %arg4[%c0_115, %c0_116] : memref<1x1xf32, #tpu.memory_space<vmem>>, vector<1x1xf32>
      tpu.vector_store %arg4[%c0_115, %c0_116], %244 {strides = array<i32>} : memref<1x1xf32, #tpu.memory_space<vmem>>, vector<1x1xf32>,
      %cst_117 = arith.constant 0.000000e+00 : f32
      %246 = vector.broadcast %cst_117 : f32 to vector<1x1xf32>
      %c0_118 = arith.constant 0 : index
      %c0_119 = arith.constant 0 : index
      %247 = vector.load %arg5[%c0_118, %c0_119] : memref<1x1xf32, #tpu.memory_space<vmem>>, vector<1x1xf32>
      tpu.vector_store %arg5[%c0_118, %c0_119], %246 {strides = array<i32>} : memref<1x1xf32, #tpu.memory_space<vmem>>, vector<1x1xf32>,
      %cst_120 = arith.constant 0.000000e+00 : f32
      %248 = vector.broadcast %cst_120 : f32 to vector<1x1xf32>
      %c0_121 = arith.constant 0 : index
      %c0_122 = arith.constant 0 : index
      %249 = vector.load %arg6[%c0_121, %c0_122] : memref<1x1xf32, #tpu.memory_space<vmem>>, vector<1x1xf32>
      tpu.vector_store %arg6[%c0_121, %c0_122], %248 {strides = array<i32>} : memref<1x1xf32, #tpu.memory_space<vmem>>, vector<1x1xf32>,
      %cst_123 = arith.constant 0.000000e+00 : f32
      %250 = vector.broadcast %cst_123 : f32 to vector<1x1xf32>
      %c0_124 = arith.constant 0 : index
      %c0_125 = arith.constant 0 : index
      %251 = vector.load %arg7[%c0_124, %c0_125] : memref<1x1xf32, #tpu.memory_space<vmem>>, vector<1x1xf32>
      tpu.vector_store %arg7[%c0_124, %c0_125], %250 {strides = array<i32>} : memref<1x1xf32, #tpu.memory_space<vmem>>, vector<1x1xf32>,
      %cst_126 = arith.constant 0.000000e+00 : f32
      %252 = vector.broadcast %cst_126 : f32 to vector<1x1xf32>
      %c0_127 = arith.constant 0 : index
      %c0_128 = arith.constant 0 : index
      %253 = vector.load %arg8[%c0_127, %c0_128] : memref<1x1xf32, #tpu.memory_space<vmem>>, vector<1x1xf32>
      tpu.vector_store %arg8[%c0_127, %c0_128], %252 {strides = array<i32>} : memref<1x1xf32, #tpu.memory_space<vmem>>, vector<1x1xf32>,
    } else {
    }
    %c0 = arith.constant 0 : index
    %c0_1 = arith.constant 0 : index
    %c0_2 = arith.constant 0 : index
    %c0_3 = arith.constant 0 : index
    %3 = vector.load %arg1[%c0, %c0_1, %c0_2, %c0_3] : memref<1x3x32x32xf32, #tpu.memory_space<vmem>>, vector<1x1x32x32xf32>
    %4 = vector.shape_cast %3 : vector<1x1x32x32xf32> to vector<32x32xf32>
    %c0_4 = arith.constant 0 : index
    %c1 = arith.constant 1 : index
    %c0_5 = arith.constant 0 : index
    %c0_6 = arith.constant 0 : index
    %5 = vector.load %arg1[%c0_4, %c1, %c0_5, %c0_6] : memref<1x3x32x32xf32, #tpu.memory_space<vmem>>, vector<1x1x32x32xf32>
    %6 = vector.shape_cast %5 : vector<1x1x32x32xf32> to vector<32x32xf32>
    %c0_7 = arith.constant 0 : index
    %c2 = arith.constant 2 : index
    %c0_8 = arith.constant 0 : index
    %c0_9 = arith.constant 0 : index
    %7 = vector.load %arg1[%c0_7, %c2, %c0_8, %c0_9] : memref<1x3x32x32xf32, #tpu.memory_space<vmem>>, vector<1x1x32x32xf32>
    %8 = vector.shape_cast %7 : vector<1x1x32x32xf32> to vector<32x32xf32>
    %c0_10 = arith.constant 0 : index
    %c0_11 = arith.constant 0 : index
    %c0_12 = arith.constant 0 : index
    %c0_13 = arith.constant 0 : index
    %9 = vector.load %arg2[%c0_10, %c0_11, %c0_12, %c0_13] : memref<1x3x32x32xf32, #tpu.memory_space<vmem>>, vector<1x1x32x32xf32>
    %10 = vector.shape_cast %9 : vector<1x1x32x32xf32> to vector<32x32xf32>
    %c0_14 = arith.constant 0 : index
    %c1_15 = arith.constant 1 : index
    %c0_16 = arith.constant 0 : index
    %c0_17 = arith.constant 0 : index
    %11 = vector.load %arg2[%c0_14, %c1_15, %c0_16, %c0_17] : memref<1x3x32x32xf32, #tpu.memory_space<vmem>>, vector<1x1x32x32xf32>
    %12 = vector.shape_cast %11 : vector<1x1x32x32xf32> to vector<32x32xf32>
    %c0_18 = arith.constant 0 : index
    %c2_19 = arith.constant 2 : index
    %c0_20 = arith.constant 0 : index
    %c0_21 = arith.constant 0 : index
    %13 = vector.load %arg2[%c0_18, %c2_19, %c0_20, %c0_21] : memref<1x3x32x32xf32, #tpu.memory_space<vmem>>, vector<1x1x32x32xf32>
    %14 = vector.shape_cast %13 : vector<1x1x32x32xf32> to vector<32x32xf32>
    %cst = arith.constant dense<0.000000e+00> : vector<32xf32>
    %15 = vector.multi_reduction <add>, %4, %cst [1] : vector<32x32xf32> to vector<32xf32>
    %16 = vector.shape_cast %15 : vector<32xf32> to vector<32x1xf32>
    %cst_22 = arith.constant dense<0.000000e+00> : vector<1xf32>
    %17 = vector.multi_reduction <add>, %16, %cst_22 [0] : vector<32x1xf32> to vector<1xf32>
    %18 = vector.shape_cast %17 : vector<1xf32> to vector<1x1xf32>
    %cst_23 = arith.constant 9.765625E-4 : f32
    %19 = vector.broadcast %cst_23 : f32 to vector<1x1xf32>
    %20 = arith.mulf %18, %19 : vector<1x1xf32>
    %cst_24 = arith.constant dense<0.000000e+00> : vector<32xf32>
    %21 = vector.multi_reduction <add>, %6, %cst_24 [1] : vector<32x32xf32> to vector<32xf32>
    %22 = vector.shape_cast %21 : vector<32xf32> to vector<32x1xf32>
    %cst_25 = arith.constant dense<0.000000e+00> : vector<1xf32>
    %23 = vector.multi_reduction <add>, %22, %cst_25 [0] : vector<32x1xf32> to vector<1xf32>
    %24 = vector.shape_cast %23 : vector<1xf32> to vector<1x1xf32>
    %cst_26 = arith.constant 9.765625E-4 : f32
    %25 = vector.broadcast %cst_26 : f32 to vector<1x1xf32>
    %26 = arith.mulf %24, %25 : vector<1x1xf32>
    %cst_27 = arith.constant dense<0.000000e+00> : vector<32xf32>
    %27 = vector.multi_reduction <add>, %8, %cst_27 [1] : vector<32x32xf32> to vector<32xf32>
    %28 = vector.shape_cast %27 : vector<32xf32> to vector<32x1xf32>
    %cst_28 = arith.constant dense<0.000000e+00> : vector<1xf32>
    %29 = vector.multi_reduction <add>, %28, %cst_28 [0] : vector<32x1xf32> to vector<1xf32>
    %30 = vector.shape_cast %29 : vector<1xf32> to vector<1x1xf32>
    %cst_29 = arith.constant 9.765625E-4 : f32
    %31 = vector.broadcast %cst_29 : f32 to vector<1x1xf32>
    %32 = arith.mulf %30, %31 : vector<1x1xf32>
    %33 = arith.subf %20, %26 : vector<1x1xf32>
    %34 = arith.subf %20, %32 : vector<1x1xf32>
    %35 = arith.subf %26, %32 : vector<1x1xf32>
    %c0_30 = arith.constant 0 : index
    %c0_31 = arith.constant 0 : index
    %36 = vector.load %arg6[%c0_30, %c0_31] : memref<1x1xf32, #tpu.memory_space<vmem>>, vector<1x1xf32>
    %37 = arith.mulf %33, %33 : vector<1x1xf32>
    %38 = arith.mulf %34, %34 : vector<1x1xf32>
    %39 = arith.addf %37, %38 : vector<1x1xf32>
    %40 = arith.mulf %35, %35 : vector<1x1xf32>
    %41 = arith.addf %39, %40 : vector<1x1xf32>
    %42 = arith.addf %36, %41 : vector<1x1xf32>
    %c0_32 = arith.constant 0 : index
    %c0_33 = arith.constant 0 : index
    %43 = vector.load %arg6[%c0_32, %c0_33] : memref<1x1xf32, #tpu.memory_space<vmem>>, vector<1x1xf32>
    tpu.vector_store %arg6[%c0_32, %c0_33], %42 {strides = array<i32>} : memref<1x1xf32, #tpu.memory_space<vmem>>, vector<1x1xf32>,
    %44 = arith.addf %4, %6 : vector<32x32xf32>
    %45 = arith.addf %10, %12 : vector<32x32xf32>
    %46 = arith.addf %44, %8 : vector<32x32xf32>
    %47 = arith.addf %45, %14 : vector<32x32xf32>
    %cst_34 = arith.constant 0.333333343 : f32
    %48 = vector.broadcast %cst_34 : f32 to vector<32x32xf32>
    %49 = arith.mulf %46, %48 : vector<32x32xf32>
    %cst_35 = arith.constant 0.333333343 : f32
    %50 = vector.broadcast %cst_35 : f32 to vector<32x32xf32>
    %51 = arith.mulf %47, %50 : vector<32x32xf32>
    %52 = tpu.iota {dimensions = array<i32: 0>} : vector<2x32xi32>
    %53 = tpu.iota {dimensions = array<i32: 1>} : vector<2x32xi32>
    %c16_i32 = arith.constant 16 : i32
    %54 = vector.broadcast %c16_i32 : i32 to vector<2x32xi32>
    %55 = arith.muli %52, %54 : vector<2x32xi32>
    %56 = arith.cmpi sge, %53, %55 : vector<2x32xi32>
    %c1_i32 = arith.constant 1 : i32
    %57 = vector.broadcast %c1_i32 : i32 to vector<2x32xi32>
    %58 = arith.addi %52, %57 : vector<2x32xi32>
    %c16_i32_36 = arith.constant 16 : i32
    %59 = vector.broadcast %c16_i32_36 : i32 to vector<2x32xi32>
    %60 = arith.muli %58, %59 : vector<2x32xi32>
    %61 = arith.cmpi slt, %53, %60 : vector<2x32xi32>
    %62 = arith.andi %56, %61 : vector<2x32xi1>
    %63 = arith.extui %62 : vector<2x32xi1> to vector<2x32xi32>
    %64 = arith.sitofp %63 : vector<2x32xi32> to vector<2x32xf32>
    %cst_37 = arith.constant 6.250000e-02 : f32
    %65 = vector.broadcast %cst_37 : f32 to vector<2x32xf32>
    %66 = arith.mulf %64, %65 : vector<2x32xf32>
    %67 = tpu.iota {dimensions = array<i32: 0>} : vector<32x2xi32>
    %68 = tpu.iota {dimensions = array<i32: 1>} : vector<32x2xi32>
    %c16_i32_38 = arith.constant 16 : i32
    %69 = vector.broadcast %c16_i32_38 : i32 to vector<32x2xi32>
    %70 = arith.muli %68, %69 : vector<32x2xi32>
    %71 = arith.cmpi sge, %67, %70 : vector<32x2xi32>
    %c1_i32_39 = arith.constant 1 : i32
    %72 = vector.broadcast %c1_i32_39 : i32 to vector<32x2xi32>
    %73 = arith.addi %68, %72 : vector<32x2xi32>
    %c16_i32_40 = arith.constant 16 : i32
    %74 = vector.broadcast %c16_i32_40 : i32 to vector<32x2xi32>
    %75 = arith.muli %73, %74 : vector<32x2xi32>
    %76 = arith.cmpi slt, %67, %75 : vector<32x2xi32>
    %77 = arith.andi %71, %76 : vector<32x2xi1>
    %78 = arith.extui %77 : vector<32x2xi1> to vector<32x2xi32>
    %79 = arith.sitofp %78 : vector<32x2xi32> to vector<32x2xf32>
    %cst_41 = arith.constant 6.250000e-02 : f32
    %80 = vector.broadcast %cst_41 : f32 to vector<32x2xf32>
    %81 = arith.mulf %79, %80 : vector<32x2xf32>
    %cst_42 = arith.constant dense<0.000000e+00> : vector<2x32xf32>
    %82 = tpu.matmul %66, %49, %cst_42 {dimension_numbers = #tpu.dot_dimension_numbers<[1], [0], [0], [1], [0, 0, 1, 1], [], []>} : vector<2x32xf32>, vector<32x32xf32>, vector<2x32xf32> -> vector<2x32xf32>
    %cst_43 = arith.constant dense<0.000000e+00> : vector<2x2xf32>
    %83 = tpu.matmul %82, %81, %cst_43 {dimension_numbers = #tpu.dot_dimension_numbers<[1], [0], [0], [1], [0, 0, 1, 1], [], []>} : vector<2x32xf32>, vector<32x2xf32>, vector<2x2xf32> -> vector<2x2xf32>
    %cst_44 = arith.constant dense<0.000000e+00> : vector<2x32xf32>
    %84 = tpu.matmul %66, %51, %cst_44 {dimension_numbers = #tpu.dot_dimension_numbers<[1], [0], [0], [1], [0, 0, 1, 1], [], []>} : vector<2x32xf32>, vector<32x32xf32>, vector<2x32xf32> -> vector<2x32xf32>
    %cst_45 = arith.constant dense<0.000000e+00> : vector<2x2xf32>
    %85 = tpu.matmul %84, %81, %cst_45 {dimension_numbers = #tpu.dot_dimension_numbers<[1], [0], [0], [1], [0, 0, 1, 1], [], []>} : vector<2x32xf32>, vector<32x2xf32>, vector<2x2xf32> -> vector<2x2xf32>
    %c0_46 = arith.constant 0 : index
    %c0_47 = arith.constant 0 : index
    %86 = vector.load %arg5[%c0_46, %c0_47] : memref<1x1xf32, #tpu.memory_space<vmem>>, vector<1x1xf32>
    %cst_48 = arith.constant 6.000000e-01 : f32
    %87 = vector.broadcast %cst_48 : f32 to vector<2x2xf32>
    %88 = arith.subf %83, %87 : vector<2x2xf32>
    %89 = math.absf %88 : vector<2x2xf32>
    %cst_49 = arith.constant dense<0.000000e+00> : vector<2xf32>
    %90 = vector.multi_reduction <add>, %89, %cst_49 [1] : vector<2x2xf32> to vector<2xf32>
    %91 = vector.shape_cast %90 : vector<2xf32> to vector<2x1xf32>
    %cst_50 = arith.constant dense<0.000000e+00> : vector<1xf32>
    %92 = vector.multi_reduction <add>, %91, %cst_50 [0] : vector<2x1xf32> to vector<1xf32>
    %93 = vector.shape_cast %92 : vector<1xf32> to vector<1x1xf32>
    %94 = arith.addf %86, %93 : vector<1x1xf32>
    %c0_51 = arith.constant 0 : index
    %c0_52 = arith.constant 0 : index
    %95 = vector.load %arg5[%c0_51, %c0_52] : memref<1x1xf32, #tpu.memory_space<vmem>>, vector<1x1xf32>
    tpu.vector_store %arg5[%c0_51, %c0_52], %94 {strides = array<i32>} : memref<1x1xf32, #tpu.memory_space<vmem>>, vector<1x1xf32>,
    %96 = arith.subf %83, %85 : vector<2x2xf32>
    %97 = tpu.iota {dimensions = array<i32: 0>} : vector<2x2xi32>
    %98 = tpu.iota {dimensions = array<i32: 1>} : vector<2x2xi32>
    %99 = arith.cmpi eq, %97, %98 : vector<2x2xi32>
    %100 = arith.extui %99 : vector<2x2xi1> to vector<2x2xi32>
    %101 = arith.sitofp %100 : vector<2x2xi32> to vector<2x2xf32>
    %c1_i32_53 = arith.constant 1 : i32
    %102 = vector.broadcast %c1_i32_53 : i32 to vector<2x2xi32>
    %103 = arith.addi %97, %102 : vector<2x2xi32>
    %104 = arith.cmpi eq, %103, %98 : vector<2x2xi32>
    %105 = arith.extui %104 : vector<2x2xi1> to vector<2x2xi32>
    %106 = arith.sitofp %105 : vector<2x2xi32> to vector<2x2xf32>
    %c1_i32_54 = arith.constant 1 : i32
    %107 = vector.broadcast %c1_i32_54 : i32 to vector<2x2xi32>
    %108 = arith.addi %98, %107 : vector<2x2xi32>
    %109 = arith.cmpi eq, %97, %108 : vector<2x2xi32>
    %110 = arith.extui %109 : vector<2x2xi1> to vector<2x2xi32>
    %111 = arith.sitofp %110 : vector<2x2xi32> to vector<2x2xf32>
    %112 = tpu.iota {dimensions = array<i32: 0>} : vector<2x2xi32>
    %113 = tpu.iota {dimensions = array<i32: 1>} : vector<2x2xi32>
    %114 = arith.cmpi eq, %112, %113 : vector<2x2xi32>
    %115 = arith.extui %114 : vector<2x2xi1> to vector<2x2xi32>
    %116 = arith.sitofp %115 : vector<2x2xi32> to vector<2x2xf32>
    %c1_i32_55 = arith.constant 1 : i32
    %117 = vector.broadcast %c1_i32_55 : i32 to vector<2x2xi32>
    %118 = arith.addi %112, %117 : vector<2x2xi32>
    %119 = arith.cmpi eq, %118, %113 : vector<2x2xi32>
    %120 = arith.extui %119 : vector<2x2xi1> to vector<2x2xi32>
    %121 = arith.sitofp %120 : vector<2x2xi32> to vector<2x2xf32>
    %c1_i32_56 = arith.constant 1 : i32
    %122 = vector.broadcast %c1_i32_56 : i32 to vector<2x2xi32>
    %123 = arith.addi %113, %122 : vector<2x2xi32>
    %124 = arith.cmpi eq, %112, %123 : vector<2x2xi32>
    %125 = arith.extui %124 : vector<2x2xi1> to vector<2x2xi32>
    %126 = arith.sitofp %125 : vector<2x2xi32> to vector<2x2xf32>
    %127 = arith.subf %116, %121 : vector<2x2xf32>
    %cst_57 = arith.constant dense<0.000000e+00> : vector<2x2xf32>
    %128 = tpu.matmul %96, %127, %cst_57 {dimension_numbers = #tpu.dot_dimension_numbers<[1], [0], [0], [1], [0, 0, 1, 1], [], []>} : vector<2x2xf32>, vector<2x2xf32>, vector<2x2xf32> -> vector<2x2xf32>
    %129 = arith.subf %116, %126 : vector<2x2xf32>
    %cst_58 = arith.constant dense<0.000000e+00> : vector<2x2xf32>
    %130 = tpu.matmul %96, %129, %cst_58 {dimension_numbers = #tpu.dot_dimension_numbers<[1], [0], [0], [1], [0, 0, 1, 1], [], []>} : vector<2x2xf32>, vector<2x2xf32>, vector<2x2xf32> -> vector<2x2xf32>
    %131 = arith.subf %101, %111 : vector<2x2xf32>
    %cst_59 = arith.constant dense<0.000000e+00> : vector<2x2xf32>
    %132 = tpu.matmul %131, %96, %cst_59 {dimension_numbers = #tpu.dot_dimension_numbers<[1], [0], [0], [1], [0, 0, 1, 1], [], []>} : vector<2x2xf32>, vector<2x2xf32>, vector<2x2xf32> -> vector<2x2xf32>
    %133 = arith.subf %101, %106 : vector<2x2xf32>
    %cst_60 = arith.constant dense<0.000000e+00> : vector<2x2xf32>
    %134 = tpu.matmul %133, %96, %cst_60 {dimension_numbers = #tpu.dot_dimension_numbers<[1], [0], [0], [1], [0, 0, 1, 1], [], []>} : vector<2x2xf32>, vector<2x2xf32>, vector<2x2xf32> -> vector<2x2xf32>
    %c0_61 = arith.constant 0 : index
    %c0_62 = arith.constant 0 : index
    %135 = vector.load %arg7[%c0_61, %c0_62] : memref<1x1xf32, #tpu.memory_space<vmem>>, vector<1x1xf32>
    %136 = arith.mulf %128, %128 : vector<2x2xf32>
    %137 = arith.mulf %130, %130 : vector<2x2xf32>
    %138 = arith.addf %136, %137 : vector<2x2xf32>
    %139 = arith.mulf %132, %132 : vector<2x2xf32>
    %140 = arith.addf %138, %139 : vector<2x2xf32>
    %141 = arith.mulf %134, %134 : vector<2x2xf32>
    %142 = arith.addf %140, %141 : vector<2x2xf32>
    %cst_63 = arith.constant dense<0.000000e+00> : vector<2xf32>
    %143 = vector.multi_reduction <add>, %142, %cst_63 [1] : vector<2x2xf32> to vector<2xf32>
    %144 = vector.shape_cast %143 : vector<2xf32> to vector<2x1xf32>
    %cst_64 = arith.constant dense<0.000000e+00> : vector<1xf32>
    %145 = vector.multi_reduction <add>, %144, %cst_64 [0] : vector<2x1xf32> to vector<1xf32>
    %146 = vector.shape_cast %145 : vector<1xf32> to vector<1x1xf32>
    %147 = arith.addf %135, %146 : vector<1x1xf32>
    %c0_65 = arith.constant 0 : index
    %c0_66 = arith.constant 0 : index
    %148 = vector.load %arg7[%c0_65, %c0_66] : memref<1x1xf32, #tpu.memory_space<vmem>>, vector<1x1xf32>
    tpu.vector_store %arg7[%c0_65, %c0_66], %147 {strides = array<i32>} : memref<1x1xf32, #tpu.memory_space<vmem>>, vector<1x1xf32>,
    %149 = tpu.iota {dimensions = array<i32: 0>} : vector<32x32xi32>
    %150 = tpu.iota {dimensions = array<i32: 1>} : vector<32x32xi32>
    %151 = arith.cmpi eq, %149, %150 : vector<32x32xi32>
    %c1_i32_67 = arith.constant 1 : i32
    %152 = vector.broadcast %c1_i32_67 : i32 to vector<32x32xi32>
    %153 = arith.cmpi sge, %149, %152 : vector<32x32xi32>
    %154 = arith.andi %151, %153 : vector<32x32xi1>
    %155 = arith.extui %154 : vector<32x32xi1> to vector<32x32xi32>
    %156 = arith.sitofp %155 : vector<32x32xi32> to vector<32x32xf32>
    %c1_i32_68 = arith.constant 1 : i32
    %157 = vector.broadcast %c1_i32_68 : i32 to vector<32x32xi32>
    %158 = arith.addi %150, %157 : vector<32x32xi32>
    %159 = arith.cmpi eq, %149, %158 : vector<32x32xi32>
    %160 = arith.extui %159 : vector<32x32xi1> to vector<32x32xi32>
    %161 = arith.sitofp %160 : vector<32x32xi32> to vector<32x32xf32>
    %162 = arith.subf %156, %161 : vector<32x32xf32>
    %163 = tpu.iota {dimensions = array<i32: 0>} : vector<32x32xi32>
    %164 = tpu.iota {dimensions = array<i32: 1>} : vector<32x32xi32>
    %165 = arith.cmpi eq, %163, %164 : vector<32x32xi32>
    %c1_i32_69 = arith.constant 1 : i32
    %166 = vector.broadcast %c1_i32_69 : i32 to vector<32x32xi32>
    %167 = arith.cmpi sge, %164, %166 : vector<32x32xi32>
    %168 = arith.andi %165, %167 : vector<32x32xi1>
    %169 = arith.extui %168 : vector<32x32xi1> to vector<32x32xi32>
    %170 = arith.sitofp %169 : vector<32x32xi32> to vector<32x32xf32>
    %c1_i32_70 = arith.constant 1 : i32
    %171 = vector.broadcast %c1_i32_70 : i32 to vector<32x32xi32>
    %172 = arith.addi %163, %171 : vector<32x32xi32>
    %173 = arith.cmpi eq, %172, %164 : vector<32x32xi32>
    %174 = arith.extui %173 : vector<32x32xi1> to vector<32x32xi32>
    %175 = arith.sitofp %174 : vector<32x32xi32> to vector<32x32xf32>
    %176 = arith.subf %170, %175 : vector<32x32xf32>
    %cst_71 = arith.constant 0.000000e+00 : f32
    %177 = vector.broadcast %cst_71 : f32 to vector<1x1xf32>
    %c0_72 = arith.constant 0 : index
    %c0_73 = arith.constant 0 : index
    %c0_74 = arith.constant 0 : index
    %c0_75 = arith.constant 0 : index
    %178 = vector.load %arg3[%c0_72, %c0_73, %c0_74, %c0_75] : memref<1x3x32x32xf32, #tpu.memory_space<vmem>>, vector<1x1x32x32xf32>
    %179 = vector.shape_cast %178 : vector<1x1x32x32xf32> to vector<32x32xf32>
    %cst_76 = arith.constant dense<0.000000e+00> : vector<32x32xf32>
    %180 = tpu.matmul %162, %179, %cst_76 {dimension_numbers = #tpu.dot_dimension_numbers<[1], [0], [0], [1], [0, 0, 1, 1], [], []>} : vector<32x32xf32>, vector<32x32xf32>, vector<32x32xf32> -> vector<32x32xf32>
    %cst_77 = arith.constant dense<0.000000e+00> : vector<32x32xf32>
    %181 = tpu.matmul %179, %176, %cst_77 {dimension_numbers = #tpu.dot_dimension_numbers<[1], [0], [0], [1], [0, 0, 1, 1], [], []>} : vector<32x32xf32>, vector<32x32xf32>, vector<32x32xf32> -> vector<32x32xf32>
    %182 = arith.mulf %180, %180 : vector<32x32xf32>
    %cst_78 = arith.constant dense<0.000000e+00> : vector<32xf32>
    %183 = vector.multi_reduction <add>, %182, %cst_78 [1] : vector<32x32xf32> to vector<32xf32>
    %184 = vector.shape_cast %183 : vector<32xf32> to vector<32x1xf32>
    %cst_79 = arith.constant dense<0.000000e+00> : vector<1xf32>
    %185 = vector.multi_reduction <add>, %184, %cst_79 [0] : vector<32x1xf32> to vector<1xf32>
    %186 = vector.shape_cast %185 : vector<1xf32> to vector<1x1xf32>
    %cst_80 = arith.constant 0.00100806449 : f32
    %187 = vector.broadcast %cst_80 : f32 to vector<1x1xf32>
    %188 = arith.mulf %186, %187 : vector<1x1xf32>
    %189 = arith.addf %177, %188 : vector<1x1xf32>
    %190 = arith.mulf %181, %181 : vector<32x32xf32>
    %cst_81 = arith.constant dense<0.000000e+00> : vector<32xf32>
    %191 = vector.multi_reduction <add>, %190, %cst_81 [1] : vector<32x32xf32> to vector<32xf32>
    %192 = vector.shape_cast %191 : vector<32xf32> to vector<32x1xf32>
    %cst_82 = arith.constant dense<0.000000e+00> : vector<1xf32>
    %193 = vector.multi_reduction <add>, %192, %cst_82 [0] : vector<32x1xf32> to vector<1xf32>
    %194 = vector.shape_cast %193 : vector<1xf32> to vector<1x1xf32>
    %cst_83 = arith.constant 0.00100806449 : f32
    %195 = vector.broadcast %cst_83 : f32 to vector<1x1xf32>
    %196 = arith.mulf %194, %195 : vector<1x1xf32>
    %197 = arith.addf %189, %196 : vector<1x1xf32>
    %c0_84 = arith.constant 0 : index
    %c1_85 = arith.constant 1 : index
    %c0_86 = arith.constant 0 : index
    %c0_87 = arith.constant 0 : index
    %198 = vector.load %arg3[%c0_84, %c1_85, %c0_86, %c0_87] : memref<1x3x32x32xf32, #tpu.memory_space<vmem>>, vector<1x1x32x32xf32>
    %199 = vector.shape_cast %198 : vector<1x1x32x32xf32> to vector<32x32xf32>
    %cst_88 = arith.constant dense<0.000000e+00> : vector<32x32xf32>
    %200 = tpu.matmul %162, %199, %cst_88 {dimension_numbers = #tpu.dot_dimension_numbers<[1], [0], [0], [1], [0, 0, 1, 1], [], []>} : vector<32x32xf32>, vector<32x32xf32>, vector<32x32xf32> -> vector<32x32xf32>
    %cst_89 = arith.constant dense<0.000000e+00> : vector<32x32xf32>
    %201 = tpu.matmul %199, %176, %cst_89 {dimension_numbers = #tpu.dot_dimension_numbers<[1], [0], [0], [1], [0, 0, 1, 1], [], []>} : vector<32x32xf32>, vector<32x32xf32>, vector<32x32xf32> -> vector<32x32xf32>
    %202 = arith.mulf %200, %200 : vector<32x32xf32>
    %cst_90 = arith.constant dense<0.000000e+00> : vector<32xf32>
    %203 = vector.multi_reduction <add>, %202, %cst_90 [1] : vector<32x32xf32> to vector<32xf32>
    %204 = vector.shape_cast %203 : vector<32xf32> to vector<32x1xf32>
    %cst_91 = arith.constant dense<0.000000e+00> : vector<1xf32>
    %205 = vector.multi_reduction <add>, %204, %cst_91 [0] : vector<32x1xf32> to vector<1xf32>
    %206 = vector.shape_cast %205 : vector<1xf32> to vector<1x1xf32>
    %cst_92 = arith.constant 0.00100806449 : f32
    %207 = vector.broadcast %cst_92 : f32 to vector<1x1xf32>
    %208 = arith.mulf %206, %207 : vector<1x1xf32>
    %209 = arith.addf %197, %208 : vector<1x1xf32>
    %210 = arith.mulf %201, %201 : vector<32x32xf32>
    %cst_93 = arith.constant dense<0.000000e+00> : vector<32xf32>
    %211 = vector.multi_reduction <add>, %210, %cst_93 [1] : vector<32x32xf32> to vector<32xf32>
    %212 = vector.shape_cast %211 : vector<32xf32> to vector<32x1xf32>
    %cst_94 = arith.constant dense<0.000000e+00> : vector<1xf32>
    %213 = vector.multi_reduction <add>, %212, %cst_94 [0] : vector<32x1xf32> to vector<1xf32>
    %214 = vector.shape_cast %213 : vector<1xf32> to vector<1x1xf32>
    %cst_95 = arith.constant 0.00100806449 : f32
    %215 = vector.broadcast %cst_95 : f32 to vector<1x1xf32>
    %216 = arith.mulf %214, %215 : vector<1x1xf32>
    %217 = arith.addf %209, %216 : vector<1x1xf32>
    %c0_96 = arith.constant 0 : index
    %c2_97 = arith.constant 2 : index
    %c0_98 = arith.constant 0 : index
    %c0_99 = arith.constant 0 : index
    %218 = vector.load %arg3[%c0_96, %c2_97, %c0_98, %c0_99] : memref<1x3x32x32xf32, #tpu.memory_space<vmem>>, vector<1x1x32x32xf32>
    %219 = vector.shape_cast %218 : vector<1x1x32x32xf32> to vector<32x32xf32>
    %cst_100 = arith.constant dense<0.000000e+00> : vector<32x32xf32>
    %220 = tpu.matmul %162, %219, %cst_100 {dimension_numbers = #tpu.dot_dimension_numbers<[1], [0], [0], [1], [0, 0, 1, 1], [], []>} : vector<32x32xf32>, vector<32x32xf32>, vector<32x32xf32> -> vector<32x32xf32>
    %cst_101 = arith.constant dense<0.000000e+00> : vector<32x32xf32>
    %221 = tpu.matmul %219, %176, %cst_101 {dimension_numbers = #tpu.dot_dimension_numbers<[1], [0], [0], [1], [0, 0, 1, 1], [], []>} : vector<32x32xf32>, vector<32x32xf32>, vector<32x32xf32> -> vector<32x32xf32>
    %222 = arith.mulf %220, %220 : vector<32x32xf32>
    %cst_102 = arith.constant dense<0.000000e+00> : vector<32xf32>
    %223 = vector.multi_reduction <add>, %222, %cst_102 [1] : vector<32x32xf32> to vector<32xf32>
    %224 = vector.shape_cast %223 : vector<32xf32> to vector<32x1xf32>
    %cst_103 = arith.constant dense<0.000000e+00> : vector<1xf32>
    %225 = vector.multi_reduction <add>, %224, %cst_103 [0] : vector<32x1xf32> to vector<1xf32>
    %226 = vector.shape_cast %225 : vector<1xf32> to vector<1x1xf32>
    %cst_104 = arith.constant 0.00100806449 : f32
    %227 = vector.broadcast %cst_104 : f32 to vector<1x1xf32>
    %228 = arith.mulf %226, %227 : vector<1x1xf32>
    %229 = arith.addf %217, %228 : vector<1x1xf32>
    %230 = arith.mulf %221, %221 : vector<32x32xf32>
    %cst_105 = arith.constant dense<0.000000e+00> : vector<32xf32>
    %231 = vector.multi_reduction <add>, %230, %cst_105 [1] : vector<32x32xf32> to vector<32xf32>
    %232 = vector.shape_cast %231 : vector<32xf32> to vector<32x1xf32>
    %cst_106 = arith.constant dense<0.000000e+00> : vector<1xf32>
    %233 = vector.multi_reduction <add>, %232, %cst_106 [0] : vector<32x1xf32> to vector<1xf32>
    %234 = vector.shape_cast %233 : vector<1xf32> to vector<1x1xf32>
    %cst_107 = arith.constant 0.00100806449 : f32
    %235 = vector.broadcast %cst_107 : f32 to vector<1x1xf32>
    %236 = arith.mulf %234, %235 : vector<1x1xf32>
    %237 = arith.addf %229, %236 : vector<1x1xf32>
    %c0_108 = arith.constant 0 : index
    %c0_109 = arith.constant 0 : index
    %238 = vector.load %arg8[%c0_108, %c0_109] : memref<1x1xf32, #tpu.memory_space<vmem>>, vector<1x1xf32>
    %239 = arith.addf %238, %237 : vector<1x1xf32>
    %c0_110 = arith.constant 0 : index
    %c0_111 = arith.constant 0 : index
    %240 = vector.load %arg8[%c0_110, %c0_111] : memref<1x1xf32, #tpu.memory_space<vmem>>, vector<1x1xf32>
    tpu.vector_store %arg8[%c0_110, %c0_111], %239 {strides = array<i32>} : memref<1x1xf32, #tpu.memory_space<vmem>>, vector<1x1xf32>,
    %c1_i32_112 = arith.constant 1 : i32
    %241 = arith.cmpi eq, %arg0, %c1_i32_112 : i32
    %242 = arith.extui %241 : i1 to i32
    %c0_i32_113 = arith.constant 0 : i32
    %243 = arith.cmpi ne, %242, %c0_i32_113 : i32
    scf.if %243 {
      %c0_114 = arith.constant 0 : index
      %c0_115 = arith.constant 0 : index
      %244 = vector.load %arg5[%c0_114, %c0_115] : memref<1x1xf32, #tpu.memory_space<vmem>>, vector<1x1xf32>
      %cst_116 = arith.constant 1.250000e-01 : f32
      %245 = vector.broadcast %cst_116 : f32 to vector<1x1xf32>
      %246 = arith.mulf %244, %245 : vector<1x1xf32>
      %c0_117 = arith.constant 0 : index
      %c0_118 = arith.constant 0 : index
      %247 = vector.load %arg6[%c0_117, %c0_118] : memref<1x1xf32, #tpu.memory_space<vmem>>, vector<1x1xf32>
      %cst_119 = arith.constant 2.500000e-01 : f32
      %248 = vector.broadcast %cst_119 : f32 to vector<1x1xf32>
      %249 = arith.mulf %247, %248 : vector<1x1xf32>
      %c0_120 = arith.constant 0 : index
      %c0_121 = arith.constant 0 : index
      %250 = vector.load %arg7[%c0_120, %c0_121] : memref<1x1xf32, #tpu.memory_space<vmem>>, vector<1x1xf32>
      %cst_122 = arith.constant 1.250000e-01 : f32
      %251 = vector.broadcast %cst_122 : f32 to vector<1x1xf32>
      %252 = arith.mulf %250, %251 : vector<1x1xf32>
      %c0_123 = arith.constant 0 : index
      %c0_124 = arith.constant 0 : index
      %253 = vector.load %arg8[%c0_123, %c0_124] : memref<1x1xf32, #tpu.memory_space<vmem>>, vector<1x1xf32>
      %cst_125 = arith.constant 1.000000e+01 : f32
      %254 = vector.broadcast %cst_125 : f32 to vector<1x1xf32>
      %255 = arith.mulf %253, %254 : vector<1x1xf32>
      %c0_126 = arith.constant 0 : index
      %c0_127 = arith.constant 0 : index
      %256 = vector.load %arg5[%c0_126, %c0_127] : memref<1x1xf32, #tpu.memory_space<vmem>>, vector<1x1xf32>
      tpu.vector_store %arg5[%c0_126, %c0_127], %246 {strides = array<i32>} : memref<1x1xf32, #tpu.memory_space<vmem>>, vector<1x1xf32>,
      %c0_128 = arith.constant 0 : index
      %c0_129 = arith.constant 0 : index
      %257 = vector.load %arg6[%c0_128, %c0_129] : memref<1x1xf32, #tpu.memory_space<vmem>>, vector<1x1xf32>
      tpu.vector_store %arg6[%c0_128, %c0_129], %249 {strides = array<i32>} : memref<1x1xf32, #tpu.memory_space<vmem>>, vector<1x1xf32>,
      %c0_130 = arith.constant 0 : index
      %c0_131 = arith.constant 0 : index
      %258 = vector.load %arg7[%c0_130, %c0_131] : memref<1x1xf32, #tpu.memory_space<vmem>>, vector<1x1xf32>
      tpu.vector_store %arg7[%c0_130, %c0_131], %252 {strides = array<i32>} : memref<1x1xf32, #tpu.memory_space<vmem>>, vector<1x1xf32>,
      %c0_132 = arith.constant 0 : index
      %c0_133 = arith.constant 0 : index
      %259 = vector.load %arg8[%c0_132, %c0_133] : memref<1x1xf32, #tpu.memory_space<vmem>>, vector<1x1xf32>
      tpu.vector_store %arg8[%c0_132, %c0_133], %255 {strides = array<i32>} : memref<1x1xf32, #tpu.memory_space<vmem>>, vector<1x1xf32>,
      %260 = arith.addf %246, %252 : vector<1x1xf32>
      %261 = arith.addf %260, %249 : vector<1x1xf32>
      %262 = arith.addf %261, %255 : vector<1x1xf32>
      %c0_134 = arith.constant 0 : index
      %c0_135 = arith.constant 0 : index
      %263 = vector.load %arg4[%c0_134, %c0_135] : memref<1x1xf32, #tpu.memory_space<vmem>>, vector<1x1xf32>
      tpu.vector_store %arg4[%c0_134, %c0_135], %262 {strides = array<i32>} : memref<1x1xf32, #tpu.memory_space<vmem>>, vector<1x1xf32>,
    } else {
    }
    return
  }
  func.func @transform_0(%arg0: i32) -> (i32, i32, i32, i32) {
    %c0_i32 = arith.constant 0 : i32
    %c0_i32_0 = arith.constant 0 : i32
    %c0_i32_1 = arith.constant 0 : i32
    %c0_i32_2 = arith.constant 0 : i32
    return %arg0, %c0_i32, %c0_i32_0, %c0_i32_1 : i32, i32, i32, i32
  }
  func.func @transform_1(%arg0: i32) -> (i32, i32, i32, i32) {
    %c0_i32 = arith.constant 0 : i32
    %c0_i32_0 = arith.constant 0 : i32
    %c0_i32_1 = arith.constant 0 : i32
    %c0_i32_2 = arith.constant 0 : i32
    return %arg0, %c0_i32, %c0_i32_0, %c0_i32_1 : i32, i32, i32, i32
  }
  func.func @transform_2(%arg0: i32) -> (i32, i32, i32, i32) {
    %c0_i32 = arith.constant 0 : i32
    %c0_i32_0 = arith.constant 0 : i32
    %c0_i32_1 = arith.constant 0 : i32
    %c0_i32_2 = arith.constant 0 : i32
    return %arg0, %c0_i32, %c0_i32_0, %c0_i32_1 : i32, i32, i32, i32
  }
  func.func @transform_3(%arg0: i32) -> (i32, i32) {
    %c0_i32 = arith.constant 0 : i32
    %c0_i32_0 = arith.constant 0 : i32
    %c0_i32_1 = arith.constant 0 : i32
    return %c0_i32, %c0_i32_0 : i32, i32
  }
  func.func @transform_4(%arg0: i32) -> (i32, i32) {
    %c0_i32 = arith.constant 0 : i32
    %c0_i32_0 = arith.constant 0 : i32
    %c0_i32_1 = arith.constant 0 : i32
    return %c0_i32, %c0_i32_0 : i32, i32
  }
  func.func @transform_5(%arg0: i32) -> (i32, i32) {
    %c0_i32 = arith.constant 0 : i32
    %c0_i32_0 = arith.constant 0 : i32
    %c0_i32_1 = arith.constant 0 : i32
    return %c0_i32, %c0_i32_0 : i32, i32
  }
  func.func @transform_6(%arg0: i32) -> (i32, i32) {
    %c0_i32 = arith.constant 0 : i32
    %c0_i32_0 = arith.constant 0 : i32
    %c0_i32_1 = arith.constant 0 : i32
    return %c0_i32, %c0_i32_0 : i32, i32
  }
  func.func @transform_7(%arg0: i32) -> (i32, i32) {
    %c0_i32 = arith.constant 0 : i32
    %c0_i32_0 = arith.constant 0 : i32
    %c0_i32_1 = arith.constant 0 : i32
    return %c0_i32, %c0_i32_0 : i32, i32
  }
}

</mosaic_0001>

<bundles_post_ra>
// kernel: tpu_custom_call.1
= control target key start
LH: loop header
LB: loop body
LE: loop exit
PB: predicated region body
PF: predicated region fallthrough
CT: control target
= control target key end

     0   :  { %s3668_s0 = inlined_call_operand.hbm [shape: f32[2,3,32,32], index: 0, kind: input, shape index: {}]   ;;  %s3669_s1 = inlined_call_operand.hbm [shape: f32[2,3,32,32], index: 1, kind: input, shape index: {}]   ;;  %s3670_s2 = inlined_call_operand.hbm [shape: f32[2,3,32,32], index: 2, kind: input, shape index: {}]   ;;  %s3671_s3 = inlined_call_operand.hbm [shape: f32[1,1], index: 3, kind: output, shape index: {0}]   ;;  %s3672_s4 = inlined_call_operand.hbm [shape: f32[1,1], index: 4, kind: output, shape index: {1}]   ;;  %s3673_s5 = inlined_call_operand.hbm [shape: f32[1,1], index: 5, kind: output, shape index: {2}]   ;;  %s3674_s6 = inlined_call_operand.hbm [shape: f32[1,1], index: 6, kind: output, shape index: {3}]   ;;  %s3675_s7 = inlined_call_operand.hbm [shape: f32[1,1], index: 7, kind: output, shape index: {4}]  }
   0x1   :  { %3681 = sst [smem:[#allocation21_spill]] %s3669_s1 }
   0x2   :  { %13 = vsyncpa [#allocation3], 0 }
   0x3   :  { %15 = vsyncpa [#allocation3 + $0x1], 0 }
   0x4   :  { %16 = vsyncpa [#allocation6], 0 }
   0x5   :  { %18 = vsyncpa [#allocation6 + $0x1], 0 }
   0x6   :  { %19 = vsyncpa [#allocation4], 0 }
   0x7   :  { %20 = vsyncpa [#allocation10], 0 }
   0x8   :  { %21 = vsyncpa [#allocation13], 0  ;;  %s2998_s24 = smov 0   ;;  %s3000_s25 = smov 0  }
   0x9   :  { %s3002_s26 = smov 0   ;;  %s3004_s27 = smov 0  }
   0xa LB: > { %s3017_s28 = sadd.s32 4294967295, %s2942_s27   ;;  %s3020_s29 = sadd.s32 1, %s2942_s27   ;;  %s2942_s27 = sphi %s3004_s27, %s3700_s27   ;;  %s2938_s26 = sphi %s3002_s26, %s3699_s26   ;;  %s2934_s25 = sphi %s3000_s25, %s3698_s25   ;;  %s2930_s24 = sphi %s2998_s24, %s3697_s24  }
   0xb   : > { %s31_s30 = ssub.s32 %s2942_s27, %s3020_s29  ;;  %s34_s8 = sadd.s32 1, %s2938_s26 }
   0xc   : > { %p32_p0 = scmp.eq.s32.totalorder %s31_s30, 0  ;;  %p41_p1 = scmp.ne.s32.totalorder %s2938_s26, %s2934_s25 }
   0xd   : > { %p42_p2 = scmp.eq.s32.totalorder %s2942_s27, 0  ;;  %p47_p3 = scmp.ne.s32.totalorder %s2934_s25, %s2930_s24 }
   0xe   : > { %s3030_s9 = scalar_select %p32_p0, %s2938_s26, %s34_s8  }
   0xf   : > { %p43_p4 = por %p42_p2, %p41_p1  ;;  %p48_p5 = scmp.eq.s32.totalorder %s3017_s28, 0 }
  0x10   : > { %3682 = sst [smem:[#allocation20_spill]] %s3030_s9  ;;  %p2618_p6 = scmp.lt.s32.totalorder %s2942_s27, 2 }
  0x11   : > { %p3034_p7 = por %p48_p5, %p47_p3  ;;  %s228_s11 = sand.u32 1, %s2938_s26  }
  0x12   : > { %s3041_s12 = smul.u32 96, %s228_s11  ;;  %p3043_p8 = pnand %p2618_p6, %p43_p4 }
  0x13   : > { %s3683_s10 = scalar_select %p3034_p7, 1, 0 }
  0x14   : > { %s3048_s14 = smul.u32 1536, %s2942_s27  ;;  %s249_s15 = sand.u32 1, %s2942_s27  }
  0x15   : > { %s3685_s1 = sld [smem:[#allocation21_spill]]  ;;  %s253_s19 = scalar_lea.vmem [#allocation5], %s3041_s12 }
  0x16   : > { %s260_s20 = sshll.u32 %s253_s19, 4  ;;  %s3062_s21 = scalar_lea.sflag [#allocation6], %s249_s15  ;;  %s3059_s20 = int_to_ptr.vmem [resolvable:$true] %s260_s20 }
  0x17   : > { %p3068_p12 = pneg %p3043_p8 }
  0x1b   : > { %s3055_s18 = scalar_lea.hbm %s3685_s1, %s3048_s14  ;;  %s2677_s8 = scalar_lea.hbm %s3685_s1, 3072 }
  0x1c   : > { %s2672_s22 = scalar_lea.hbm %s3055_s18, 1536  ;;  %p2678_p1 = scmp.lt.u32.totalorder %s3055_s18, %s3685_s1 }
  0x1d   : > { %p2673_p11 = scmp.ne.s32.totalorder %s3055_s18, %s2672_s22  ;;  %p2679_p2 = scmp.lt.u32.totalorder %s2677_s8, %s2672_s22 }
  0x1e   : > { %p2681_p4 = scmp.lt.u32.totalorder %s2672_s22, %s3055_s18 }
  0x1f   : > { %p2675_p13 = pnand %p3068_p12, %p2673_p11  ;;  %p2680_p3 = por %p2679_p2, %p2678_p1 }
  0x21   : > { %p2676_p0 = pneg %p2675_p13  ;;  %p2682_p5 = por %p2681_p4, %p2680_p3 }
  0x23   : > { %p2683_p6 = pnand %p2682_p5, %p2676_p0 }
  0x25   : > { %2686 = shalt.err (!%p2683_p6)
}
  0x26   : > { %s2687_s15 = scalar_lea.vmem %s3059_s20, 1536  ;;  %s2944_s19 = smov [#allocation5]  }
  0x27   : > { %p2688_p11 = scmp.ne.s32.totalorder %s3059_s20, %s2687_s15  ;;  %s2692_s24 = sshll.u32 %s2944_s19, 4  ;;  %s2693_s24 = int_to_ptr.vmem [resolvable:$false] %s2692_s24 }
  0x28   : > { %s2694_s30 = scalar_lea.vmem %s2693_s24, 3072  ;;  %p2695_p10 = scmp.lt.s32.totalorder %s3059_s20, %s2693_s24 }
  0x29   : > { %p2690_p13 = pnand %p2688_p11, %p3068_p12  ;;  %p2696_p7 = scmp.lt.s32.totalorder %s2694_s30, %s2687_s15 }
  0x2b   : > { %p2691_p9 = pneg %p2690_p13  ;;  %p2697_p1 = por %p2696_p7, %p2695_p10 }
  0x2d   : > { %p2698_p2 = pnand %p2697_p1, %p2691_p9 }
  0x2f   : > { %2701 = shalt.err (!%p2698_p2)
}
  0x30   : > { %s3677_s22 = smov 128   ;;  %s3679_s8 = smov 8  }
  0x31   : > { %2614 = dma.hbm_to_vmem [thread:$0]  (!%p3043_p8), %s3055_s18, 1536, %s3059_s20, %s3062_s21, %s3677_s22, %s3677_s22, %s3679_s8  }
  0x32   : > { %p3687_p7 = scmp.lt.s32.totalorder %s2942_s27, 3  ;;  %p3688_p9 = scmp.ge.s32.totalorder %s2942_s27, 1 }
  0x33   : > { %s3107_s19 = scalar_lea.hbm %s3668_s0, %s3048_s14  ;;  %s232_s24 = scalar_lea.vmem [#allocation2], %s3041_s12 }
  0x34   : > { %p3099_p10 = pnand %p3688_p9, %p3687_p7  ;;  %s239_s30 = sshll.u32 %s232_s24, 4  ;;  %s3110_s30 = int_to_ptr.vmem [resolvable:$true] %s239_s30 }
  0x35   : > { %s3116_s27 = scalar_lea.hbm %s3670_s2, %s3048_s14  ;;  %s3120_s22 = scalar_lea.sflag [#allocation3], %s228_s11 }
  0x36   : > { %s3689_s16 = scalar_select %p3099_p10, 1, 0 }
  0x37   : > { %s2702_s8 = scalar_lea.hbm %s3107_s19, 1536  ;;  %s2707_s1 = scalar_lea.hbm %s3668_s0, 3072 }
  0x38   : > { %p2703_p0 = scmp.ne.s32.totalorder %s3107_s19, %s2702_s8  ;;  %p2708_p5 = scmp.lt.u32.totalorder %s3107_s19, %s3668_s0 }
  0x39   : > { %p2709_p6 = scmp.lt.u32.totalorder %s2707_s1, %s2702_s8  ;;  %p2711_p13 = scmp.lt.u32.totalorder %s2702_s8, %s3107_s19 }
  0x3a   : > { %p2705_p3 = pnand %p2703_p0, %p3068_p12 }
  0x3b   : > { %p2710_p11 = por %p2709_p6, %p2708_p5 }
  0x3c   : > { %p2706_p4 = pneg %p2705_p3 }
  0x3d   : > { %p2712_p1 = por %p2711_p13, %p2710_p11 }
  0x3f   : > { %p2713_p2 = pnand %p2712_p1, %p2706_p4 }
  0x41   : > { %2716 = shalt.err (!%p2713_p2)
}
  0x42   : > { %s2717_s11 = scalar_lea.vmem %s3110_s30, 1536  ;;  %s2947_s14 = smov [#allocation2]  }
  0x43   : > { %p2718_p7 = scmp.ne.s32.totalorder %s3110_s30, %s2717_s11  ;;  %s2722_s18 = sshll.u32 %s2947_s14, 4  ;;  %s2723_s18 = int_to_ptr.vmem [resolvable:$false] %s2722_s18 }
  0x44   : > { %s2724_s9 = scalar_lea.vmem %s2723_s18, 3072  ;;  %p2725_p3 = scmp.lt.s32.totalorder %s3110_s30, %s2723_s18 }
  0x45   : > { %p2720_p9 = pnand %p2718_p7, %p3068_p12  ;;  %p2726_p10 = scmp.lt.s32.totalorder %s2724_s9, %s2717_s11 }
  0x47   : > { %p2721_p0 = pneg %p2720_p9  ;;  %p2727_p5 = por %p2726_p10, %p2725_p3 }
  0x49   : > { %p2728_p6 = pnand %p2727_p5, %p2721_p0 }
  0x4b   : > { %2731 = shalt.err (!%p2728_p6)
}
  0x4c   : > { %s3690_s1 = smov 8   ;;  %s3691_s8 = smov 128  }
  0x4d   : > { %2611 = dma.hbm_to_vmem [thread:$0]  (!%p3043_p8), %s3107_s19, 1536, %s3110_s30, %s3120_s22, %s3691_s8, %s3691_s8, %s3690_s1  }
  0x4e   : > { %s274_s20 = scalar_lea.vmem [#allocation7], %s3041_s12  ;;  %s2732_s15 = scalar_lea.hbm %s3116_s27, 1536 }
  0x4f   : > { %s281_s17 = sshll.u32 %s274_s20, 4  ;;  %p2733_p10 = scmp.ne.s32.totalorder %s3116_s27, %s2732_s15  ;;  %s3148_s17 = int_to_ptr.vmem [resolvable:$true] %s281_s17 }
  0x50   : > { %s2737_s14 = scalar_lea.hbm %s3670_s2, 3072  ;;  %p2738_p13 = scmp.lt.u32.totalorder %s3116_s27, %s3670_s2 }
  0x51   : > { %p2735_p4 = pnand %p2733_p10, %p3068_p12  ;;  %p2739_p1 = scmp.lt.u32.totalorder %s2737_s14, %s2732_s15 }
  0x52   : > { %p2741_p7 = scmp.lt.u32.totalorder %s2732_s15, %s3116_s27 }
  0x53   : > { %p2736_p11 = pneg %p2735_p4  ;;  %p2740_p2 = por %p2739_p1, %p2738_p13 }
  0x55   : > { %p2742_p9 = por %p2741_p7, %p2740_p2 }
  0x57   : > { %p2743_p0 = pnand %p2742_p9, %p2736_p11 }
  0x59   : > { %2746 = shalt.err (!%p2743_p0)
}
  0x5a   : > { %s2747_s12 = scalar_lea.vmem %s3148_s17, 1536  ;;  %s2948_s22 = smov [#allocation7]  }
  0x5b   : > { %p2748_p3 = scmp.ne.s32.totalorder %s3148_s17, %s2747_s12  ;;  %s2752_s19 = sshll.u32 %s2948_s22, 4  ;;  %s2753_s19 = int_to_ptr.vmem [resolvable:$false] %s2752_s19 }
  0x5c   : > { %s2754_s30 = scalar_lea.vmem %s2753_s19, 3072  ;;  %p2755_p10 = scmp.lt.s32.totalorder %s3148_s17, %s2753_s19 }
  0x5d   : > { %p2750_p5 = pnand %p2748_p3, %p3068_p12  ;;  %p2756_p4 = scmp.lt.s32.totalorder %s2754_s30, %s2747_s12 }
  0x5f   : > { %p2751_p6 = pneg %p2750_p5  ;;  %p2757_p13 = por %p2756_p4, %p2755_p10 }
  0x61   : > { %p2758_p1 = pnand %p2757_p13, %p2751_p6 }
  0x63   : > { %2761 = shalt.err (!%p2758_p1)
}
  0x64   : > { %2617 = dma.hbm_to_vmem [thread:$0]  (!%p3043_p8), %s3116_s27, 1536, %s3148_s17, %s3062_s21, %s3691_s8, %s3691_s8, %s3690_s1  }
  0x65   : > { %p3692_p12 = scmp.ne.s32.totalorder %s3689_s16, 0 }
  0x66   : > { %s295_s23 = sand.u32 (!%p3692_p12), 1, %s2934_s25   ;;  %p3693_p11 = scmp.ne.s32.totalorder (!%p3692_p12), %s3683_s10, 0 }
  0x67   : > { %293 = sbr.rel (%p3692_p12) target bundleno = 1144 (0x478), region = 32  ;;  %s296_s15 = scalar_lea.sflag (!%p3692_p12), [#allocation3], %s295_s23 }
  0x68   : > { %s2581_s20 = smul.u32 (!%p3692_p12), 96, %s295_s23 }
  0x6a   : > { %s3178_s24 = scalar_lea.vmem (!%p3692_p12), [#allocation2], %s2581_s20 }
  0x6e   : > { %2909 = dma.done.wait (%p3693_p11), %s296_s15, 1536  }
  0x6f   : > { %2911 = vsyncadd (%p3693_p11), %s296_s15, 4294965760  ;;  %s304_s13 = sand.u32 1, %s3017_s28   ;;  %s3185_s21 = scalar_lea.vmem [#allocation5], %s2581_s20 }
  0x70   : > { %s305_s11 = scalar_lea.sflag [#allocation6], %s304_s13 }
  0x71   : > { %2913 = dma.done.wait (%p3693_p11), %s305_s11, 3072  }
  0x72   : > { %2915 = vsyncadd (%p3693_p11), %s305_s11, 4294964224  ;;  %s3191_s16 = scalar_lea.vmem [#allocation7], %s2581_s20  ;;  %p2182_p8 = scmp.ne.s32.totalorder %s3017_s28, 0 }
  0x73   : > { %vm357_vm0 = vcmask (!%p2182_p8), 0   ;;  %v2949_v0 = vmov (!%p2182_p8), 0.0  }
  0x74   : > { %356 = sbr.rel (%p2182_p8) target bundleno = 123 (0x7b), region = 48  ;;  %358 = vst.msk [vmem:[#allocation8] sm:$0x1] (!%p2182_p8), %vm357_vm0, %v2949_v0  ;;  %359 = vst.msk [vmem:[#allocation9] sm:$0x1] (!%p2182_p8), %vm357_vm0, %v2949_v0 }
  0x75   : > { %360 = vst.msk [vmem:[#allocation11] sm:$0x1] (!%p2182_p8), %vm357_vm0, %v2949_v0  ;;  %361 = vst.msk [vmem:[#allocation12] sm:$0x1] (!%p2182_p8), %vm357_vm0, %v2949_v0 }
  0x76   : > { %362 = vst.msk [vmem:[#allocation14] sm:$0x1] (!%p2182_p8), %vm357_vm0, %v2949_v0 }
  0x7b PF: > { %v3195_v1 = vld [vmem:[%s3178_s24] sm:$0xff]  ;;  %v3198_v2 = vld [vmem:[%s3178_s24 + $0x8] sm:$0xff]  ;;  %v494_v4 = vlaneseq  ;;  %v2950_v5 = vmov 0.0|0.0   ;;  %vm2951_vm1 = vmmov 0   ;;  %v2952_v10 = vmov 0.0   ;;  %v3220_v12 = vld [vmem:[%s3178_s24 + $0x10] sm:$0xff] }
  0x7c   : > { %v3201_v3 = vld [vmem:[%s3178_s24 + $0x20] sm:$0xff]  ;;  %2503 = vmatprep.subr.bf16.mxu0 %v2950_v5  ;;  %v3205_v6 = vld [vmem:[%s3178_s24 + $0x28] sm:$0xff]  ;;  %2363 = vmatprep.mubr.msk.f32.mxu0 %vm2951_vm1, %v2952_v10  ;;  %v3223_v13 = vld [vmem:[%s3178_s24 + $0x18] sm:$0xff]  ;;  %vm391_vm5 = vcmask 261120   ;;  %p2266_p2 = scmp.ne.s32.totalorder %s3017_s28, 1 }
  0x7d   : > { %v3208_v7 = vld [vmem:[%s3178_s24 + $0x40] sm:$0xff]  ;;  %v3211_v8 = vld [vmem:[%s3178_s24 + $0x48] sm:$0xff]  ;;  %v470_v9 = vadd.f32 %v3201_v3, %v3195_v1  ;;  %v471_v11 = vadd.f32 %v3205_v6, %v3198_v2  ;;  %v3226_v14 = vld [vmem:[%s3178_s24 + $0x30] sm:$0xff]  ;;  %v3228_v15 = vshrl.u32 %v494_v4, 7  ;;  %v3230_v16 = vand.u32 127, %v494_v4  ;;  %2509 = vmatprep.subr.bf16.mxu1 %v2950_v5  ;;  %2374 = vmatprep.mubr.msk.f32.mxu1 %vm2951_vm1, %v2952_v10 }
  0x7e   : > { %v3237_v18 = vld [vmem:[%s3178_s24 + $0x38] sm:$0xff]  ;;  %v3240_v19 = vld [vmem:[%s3178_s24 + $0x50] sm:$0xff]  ;;  %v472_v21 = vadd.f32 %v3226_v14, %v3220_v12  ;;  %v377_v26 = vld [vmem:[%s3185_s21] sm:$0xff] }
  0x7f   : > { %v478_v17 = vadd.f32 %v3208_v7, %v470_v9  ;;  %v3243_v20 = vld [vmem:[%s3178_s24 + $0x58] sm:$0xff]  ;;  %v479_v22 = vadd.f32 %v3211_v8, %v471_v11  ;;  %v473_v23 = vadd.f32 %v3237_v18, %v3223_v13  ;;  %v498_v24 = vmul.u32 16, %v3228_v15  ;;  %v378_v27 = vld [vmem:[%s3185_s21 + $0x8] sm:$0xff]  ;;  %v2191_v28 = vld [vmem:[%s3185_s21 + $0x20] sm:$0xff] }
  0x80   : > { %v3252_v25 = vadd.s32 1, %v3228_v15  ;;  %v480_v30 = vadd.f32 %v3240_v19, %v472_v21  ;;  %v2192_v31 = vld [vmem:[%s3185_s21 + $0x28] sm:$0xff]  ;;  %v2195_v32 = vld [vmem:[%s3185_s21 + $0x40] sm:$0xff]  ;;  %v474_v34 = vadd.f32 %v2191_v28, %v377_v26  ;;  %v3262_v35 = vadd.s32 8, %v3228_v15  ;;  %v379_v40 = vld [vmem:[%s3185_s21 + $0x10] sm:$0xff] }
  0x81   : > { %v486_v29 = vmul.f32 0.33333334, %v478_v17  ;;  %v2196_v33 = vld [vmem:[%s3185_s21 + $0x48] sm:$0xff]  ;;  %v487_v36 = vmul.f32 0.33333334, %v479_v22  ;;  %v481_v37 = vadd.f32 %v3243_v20, %v473_v23  ;;  %vm3266_vm2 = vcmp.ge.s32.totalorder %v3230_v16, %v498_v24  ;;  %v380_v41 = vld [vmem:[%s3185_s21 + $0x18] sm:$0xff] }
  0x82   : > { %v501_v39 = vmul.u32 16, %v3252_v25  ;;  %v2193_v42 = vld [vmem:[%s3185_s21 + $0x30] sm:$0xff]  ;;  %v488_v43 = vmul.f32 0.33333334, %v480_v30  ;;  %v475_v44 = vadd.f32 %v2192_v31, %v378_v27  ;;  %v482_v45 = vadd.f32 %v2195_v32, %v474_v34  ;;  %v2194_v46 = vld [vmem:[%s3185_s21 + $0x38] sm:$0xff] }
  0x83   : > { %v2197_v47 = vld [vmem:[%s3185_s21 + $0x50] sm:$0xff]  ;;  %v2198_v48 = vld [vmem:[%s3185_s21 + $0x58] sm:$0xff]  ;;  %v476_v49 = vadd.f32 %v2193_v42, %v379_v40  ;;  %v2504_v50 = vpack.c.bf16 %v487_v36, %v486_v29  ;;  %v489_v51 = vmul.f32 0.33333334, %v481_v37  ;;  %v477_v52 = vadd.f32 %v2194_v46, %v380_v41 }
  0x84   : > { %vm502_vm3 = vcmp.lt.s32.totalorder %v3230_v16, %v501_v39  ;;  %v483_v53 = vadd.f32 %v2196_v33, %v475_v44  ;;  %v490_v54 = vmul.f32 0.33333334, %v482_v45  ;;  %v510_v56 = vmul.u32 16, %v3230_v16 }
  0x85   : > { %vm503_vm4 = vmand %vm3266_vm2, %vm502_vm3  ;;  %v484_v55 = vadd.f32 %v2197_v47, %v476_v49  ;;  %2505 = vmatpush3.bf16.msra.mxu0 %v2504_v50  ;;  %v2507_v57 = vpack.c.bf16 %v489_v51, %v488_v43  ;;  %v485_v59 = vadd.f32 %v2198_v48, %v477_v52  ;;  %v3283_v60 = vadd.s32 1, %v3230_v16 }
  0x86   : > { %v2199_v58 = vsel %vm503_vm4, 1.0, %v2952_v10  ;;  %2506 = vmatprep.subr.bf16.mxu0 %v2950_v5  ;;  %v491_v61 = vmul.f32 0.33333334, %v483_v53  ;;  %vm511_vm6 = vcmp.ge.s32.totalorder %v3228_v15, %v510_v56  ;;  %v3289_v0 = vadd.s32 16, %v3228_v15 }
  0x87   : > { %v506_v62 = vmul.f32 0.0625, %v2199_v58  ;;  %v516_v63 = vmul.u32 16, %v3283_v60  ;;  %v492_v4 = vmul.f32 0.33333334, %v484_v55  ;;  %v493_v9 = vmul.f32 0.33333334, %v485_v59 }
  0x88   : > { %vm512_vm7 = vcmp.ge.s32.totalorder %v3262_v35, %v510_v56  ;;  %v3293_v11 = vadd.s32 24, %v3228_v15  ;;  %v2516_v17 = vpack.c.bf16 %v491_v61, %v490_v54  ;;  %vm513_vm10 = vcmp.ge.s32.totalorder %v3289_v0, %v510_v56 }
  0x89   : > { %2508 = vmatpush3.bf16.msra.mxu0 %v2507_v57  ;;  %vm517_vm8 = vcmp.lt.s32.totalorder %v3228_v15, %v516_v63  ;;  %vm518_vm9 = vcmp.lt.s32.totalorder %v3262_v35, %v516_v63  ;;  %vm519_vm13 = vcmp.lt.s32.totalorder %v3289_v0, %v516_v63  ;;  %v2519_v24 = vpack.c.bf16 %v493_v9, %v492_v4  ;;  %v1233_v57 = vld [vmem:[%s3191_s16 + $0x8] sm:$0xff] }
  0x8a   : > { %2515 = vmatprep.subr.bf16.mxu0 %v2950_v5  ;;  %vm521_vm11 = vmand %vm511_vm6, %vm517_vm8  ;;  %vm514_vm12 = vcmp.ge.s32.totalorder %v3293_v11, %v510_v56  ;;  %vm520_vm14 = vcmp.lt.s32.totalorder %v3293_v11, %v516_v63  ;;  %vm844_vm3 = vcmp.eq.s32.totalorder %v3228_v15, %v3230_v16  ;;  %vm850_vm4 = vcmp.eq.s32.totalorder %v3228_v15, %v3283_v60  ;;  %v1232_v56 = vld [vmem:[%s3191_s16] sm:$0xff] }
  0x8b   : > { %vm522_vm15 = vmand %vm512_vm7, %vm518_vm9  ;;  %v2200_v21 = vsel %vm521_vm11, 1.0, %v2952_v10  ;;  %vm833_vm6 = vcmask 1041408   ;;  %v2211_v38 = vsel %vm850_vm4, 1.0, %v2952_v10  ;;  %vm847_vm7 = vcmp.eq.s32.totalorder %v3252_v25, %v3230_v16 }
  0x8c   : > { %2364 = vmatmul.mubr.msk.f32.vlgmr.msra.gmra.mrb[0].mxu0 %vm391_vm5, %v506_v62  ;;  %v2201_v22 = vsel %vm522_vm15, 1.0, %v2952_v10  ;;  %v533_v23 = vmul.f32 0.0625, %v2200_v21  ;;  %vm523_vm0 = vmand %vm513_vm10, %vm519_vm13  ;;  %v3338_v40 = vsel %vm847_vm7, 1.0, %v2952_v10  ;;  %vm1203_vm8 = vcmp.ge.s32.totalorder %v3230_v16, 1  ;;  %v1235_v21 = vld [vmem:[%s3191_s16 + $0x18] sm:$0xff] }
  0x8d   : > { %2517 = vmatpush3.bf16.msra.mxu0 %v2516_v17  ;;  %2385 = vmatprep.mubr.msk.f32.mxu0 %vm2951_vm1, %v2952_v10  ;;  %v534_v26 = vmul.f32 0.0625, %v2201_v22  ;;  %vm524_vm2 = vmand %vm514_vm12, %vm520_vm14  ;;  %v2202_v27 = vsel %vm523_vm0, 1.0, %v2952_v10  ;;  %vm1174_vm10 = vcmp.ge.s32.totalorder %v3228_v15, 1  ;;  %v392_v45 = vsel %vm391_vm5, %v3195_v1, 0.0  ;;  %v1234_v17 = vld [vmem:[%s3191_s16 + $0x10] sm:$0xff] }
  0x8e   : > { %2518 = vmatprep.subr.bf16.mxu0 %v2950_v5  ;;  %v2203_v28 = vsel %vm524_vm2, 1.0, %v2952_v10  ;;  %v535_v29 = vmul.f32 0.0625, %v2202_v27  ;;  %vm1204_vm9 = vmand %vm844_vm3, %vm1203_vm8  ;;  %v395_v46 = vsel %vm391_vm5, %v3198_v2, 0.0  ;;  %393 = vadd.xlane.f32.xlu0 %v392_v45  ;;  %v414_v47 = vsel %vm391_vm5, %v3201_v3, 0.0 }
  0x8f   : > { %v2510_v30 = vpack.c.bf16 %v534_v26, %v533_v23  ;;  %v536_v31 = vmul.f32 0.0625, %v2203_v28  ;;  %v2227_v25 = vsel %vm1204_vm9, 1.0, %v2952_v10  ;;  %vm1178_vm11 = vmand %vm844_vm3, %vm1174_vm10  ;;  %396 = vadd.xlane.f32.xlu1 %v395_v46  ;;  %v417_v48 = vsel %vm391_vm5, %v3205_v6, 0.0  ;;  %v2243_v26 = vld [vmem:[%s3191_s16 + $0x28] sm:$0xff] }
  0x90   : > { %v1228_v42 = vsub.f32 %v2227_v25, %v3338_v40  ;;  %v2220_v43 = vsel %vm1178_vm11, 1.0, %v2952_v10  ;;  %v436_v15 = vsel %vm391_vm5, %v3208_v7, 0.0  ;;  %v439_v49 = vsel %vm391_vm5, %v3211_v8, 0.0 }
  0x91   : > { %2520 = vmatpush3.bf16.msra.mxu0 %v2519_v24  ;;  %2511 = vmatpush3.bf16.msra.mxu1 %v2510_v30  ;;  %v2513_v32 = vpack.c.bf16 %v536_v31, %v535_v29  ;;  %v3362_v44 = vsub.f32 %v2220_v43, %v2211_v38  ;;  %v398_v1 = vsel %vm391_vm5, %v3220_v12, 0.0  ;;  %v420_v2 = vsel %vm391_vm5, %v3226_v14, 0.0  ;;  %v2242_v24 = vld [vmem:[%s3191_s16 + $0x20] sm:$0xff] }
  0x92   : > { %2512 = vmatprep.subr.bf16.mxu1 %v2950_v5  ;;  %2399 = vmatprep.subr.mxu0 %v2952_v10  ;;  %v442_v3 = vsel %vm391_vm5, %v3240_v19, 0.0  ;;  %v423_v6 = vsel %vm391_vm5, %v3237_v18, 0.0  ;;  %v401_v7 = vsel %vm391_vm5, %v3223_v13, 0.0  ;;  %v445_v8 = vsel %vm391_vm5, %v3243_v20, 0.0 }
  0x93   : > { %415 = vadd.xlane.f32.xlu0 %v414_v47  ;;  %418 = vadd.xlane.f32.xlu1 %v417_v48  ;;  %v1216_v12 = vadd.s32 1, %v3262_v35  ;;  %vm1171_vm12 = vcmp.eq.s32.totalorder %v3262_v35, %v3230_v16  ;;  %vm1172_vm15 = vcmp.eq.s32.totalorder %v3289_v0, %v3230_v16  ;;  %v1217_v13 = vadd.s32 1, %v3289_v0 }
  0x94   : > { %2386 = vmatmul.mubr.msk.f32.vlgmr.msra.gmra.mrb[2].mxu0 %vm391_vm5, %v506_v62  ;;  %vm1205_vm13 = vmand %vm1171_vm12, %vm1203_vm8  ;;  %v1218_v14 = vadd.s32 1, %v3293_v11  ;;  %vm1173_vm0 = vcmp.eq.s32.totalorder %v3293_v11, %v3230_v16  ;;  %vm854_vm9 = vcmask 15360   ;;  %v2527_v9 = vpack.c.bf16 %v1233_v57, %v1232_v56 }
  0x95   : > { %2514 = vmatpush3.bf16.msra.mxu1 %v2513_v32  ;;  %2401 = vmatprep.mubr.msk.f32.mxu0 %vm2951_vm1, %v2952_v10  ;;  %vm1219_vm14 = vcmp.eq.s32.totalorder %v1216_v12, %v3230_v16  ;;  %v2228_v20 = vsel %vm1205_vm13, 1.0, %v2952_v10  ;;  %vm1206_vm2 = vmand %vm1172_vm15, %vm1203_vm8  ;;  %vm1220_vm4 = vcmp.eq.s32.totalorder %v1217_v13, %v3230_v16  ;;  %v2531_v22 = vpack.c.bf16 %v1235_v21, %v1234_v17 }
  0x96   : > { %2521 = vmatprep.subr.bf16.mxu1 %v2950_v5  ;;  %v2231_v50 = vsel %vm1219_vm14, 1.0, %v2952_v10  ;;  %vm1221_vm7 = vcmp.eq.s32.totalorder %v1218_v14, %v3230_v16  ;;  %v2229_v52 = vsel %vm1206_vm2, 1.0, %v2952_v10  ;;  %v2232_v54 = vsel %vm1220_vm4, 1.0, %v2952_v10  ;;  %v2256_v16 = vld [vmem:[%s3191_s16 + $0x50] sm:$0xff] }
  0x97   : > { %437 = vadd.xlane.f32.xlu0 %v436_v15  ;;  %440 = vadd.xlane.f32.xlu1 %v439_v49  ;;  %v1229_v51 = vsub.f32 %v2228_v20, %v2231_v50  ;;  %v2233_v55 = vsel %vm1221_vm7, 1.0, %v2952_v10  ;;  %v1230_v62 = vsub.f32 %v2229_v52, %v2232_v54  ;;  %vm1191_vm10 = vcmp.eq.s32.totalorder %v3289_v0, %v3283_v60 }
  0x98   : > { %v2221_v27 = vsel %vm1171_vm12, 1.0, %v2952_v10  ;;  %v2222_v29 = vsel %vm1172_vm15, 1.0, %v2952_v10  ;;  %v2543_v31 = vpack.c.bf16 %v2243_v26, %v2242_v24  ;;  %vm468_vm11 = vcmask 0  }
  0x99   : > { %v3426_v4 = vpack.c.bf16 %v1229_v51, %v1228_v42  ;;  %vm829_vm12 = vcmask 9216  }
  0x9b   : > { %399 = vadd.xlane.f32.xlu0 %v398_v1  ;;  %421 = vadd.xlane.f32.xlu1 %v420_v2 }
  0x9f   : > { %443 = vadd.xlane.f32.xlu0 %v442_v3  ;;  %424 = vadd.xlane.f32.xlu1 %v423_v6 }
  0xa3   : > { %402 = vadd.xlane.f32.xlu0 %v401_v7 }
  0xa7   : > { %446 = vadd.xlane.f32.xlu0 %v445_v8 }
 0x11c   : > { %v397_v25 = vpop.xlane.xlu1 %396 }
 0x120   : > { %v419_v43 = vpop.xlane.xlu1 %418 }
 0x124   : > { %v441_v45 = vpop.xlane.xlu1 %440 }
 0x128   : > { %v422_v47 = vpop.xlane.xlu1 %421 }
 0x12c   : > { %v425_v7 = vpop.xlane.xlu1 %424 }
 0x15f   : > { %v606_v33 = vpop.f32.mrb[0].mxu0 }
 0x160   : > { %v2365_v34 = vpop.f32.mrb[1].mxu0  ;;  %2375 = vmatmul.mubr.msk.f32.vlgmr.msra.gmra.mrb[0].mxu1 %vm391_vm5, %v606_v33  ;;  %v2245_v33 = vld [vmem:[%s3191_s16 + $0x38] sm:$0xff] }
 0x161   : > { %2523 = vmatpush3.bf16.msra.mxu1 %v2510_v30  ;;  %2396 = vmatprep.mubr.msk.f32.mxu1 %vm2951_vm1, %v2952_v10  ;;  %v2225_v30 = vsel %vm1191_vm10, 1.0, %v2952_v10 }
 0x162   : > { %2524 = vmatprep.subr.bf16.mxu1 %v2950_v5  ;;  %v2209_v5 = vsel %vm844_vm3, 1.0, %v2952_v10  ;;  %vm1207_vm3 = vmand %vm1173_vm0, %vm1203_vm8  ;;  %vm1190_vm8 = vcmp.eq.s32.totalorder %v3262_v35, %v3283_v60  ;;  %v1201_v0 = vsub.f32 %v2222_v29, %v2225_v30 }
 0x163   : > { %v3333_v39 = vsub.f32 %v2209_v5, %v2211_v38  ;;  %v3343_v41 = vsub.f32 %v2209_v5, %v3338_v40  ;;  %v2230_v53 = vsel %vm1207_vm3, 1.0, %v2952_v10  ;;  %v2224_v28 = vsel %vm1190_vm8, 1.0, %v2952_v10  ;;  %v2254_v5 = vld [vmem:[%s3191_s16 + $0x40] sm:$0xff]  ;;  %v2255_v38 = vld [vmem:[%s3191_s16 + $0x48] sm:$0xff]  ;;  %v394_v40 = vpop.xlane.xlu0 %393 }
 0x164   : > { %v1231_v63 = vsub.f32 %v2230_v53, %v2233_v55  ;;  %v1200_v35 = vsub.f32 %v2221_v27, %v2224_v28  ;;  %v404_v15 = vadd.f32 %v397_v25, %v394_v40 }
 0x165   : > { %2526 = vmatpush3.bf16.msra.mxu1 %v2513_v32  ;;  %2400 = vmatpush3.msk.msra.mxu0 %vm833_vm6, %v3343_v41  ;;  %v2244_v32 = vld [vmem:[%s3191_s16 + $0x30] sm:$0xff] }
 0x166   : > { %2404 = vmatprep.subr.mxu1 %v2952_v10  ;;  %2409 = vmatprep.subr.mxu0 %v2952_v10  ;;  %v3438_v23 = vpack.c.bf16 %v1231_v63, %v1230_v62 }
 0x167   : > { %v749_v36 = vpop.f32.mrb[2].mxu0 }
 0x168   : > { %v2387_v37 = vpop.f32.mrb[3].mxu0  ;;  %2397 = vmatmul.mubr.msk.f32.vlgmr.msra.gmra.mrb[2].mxu1 %vm391_vm5, %v749_v36  ;;  %v2547_v36 = vpack.c.bf16 %v2245_v33, %v2244_v32 }
 0x169   : > { %2406 = vmatprep.mubr.msk.f32.mxu1 %vm2951_vm1, %v2952_v10  ;;  %2405 = vmatpush3.msk.msra.mxu1 %vm833_vm6, %v3333_v39 }
 0x16a   : > { %2414 = vmatprep.subr.mxu1 %v2952_v10 }
 0x233   : > { %v3401_v18 = vpop.f32.mrb[0].mxu1 }
 0x234   : > { %v2376_v19 = vpop.f32.mrb[1].mxu1 }
 0x23b   : > { %v822_v58 = vpop.f32.mrb[2].mxu1 }
 0x23c   : > { %v843_v59 = vsub.f32 %v3401_v18, %v822_v58  ;;  %v2398_v61 = vpop.f32.mrb[3].mxu1 }
 0x23e   : > { %2402 = vmatmul.mubr.msk.f32.vlgmr.msra.gmra.mrb[4].mxu0 %vm854_vm9, %v843_v59  ;;  %2407 = vmatmul.mubr.msk.f32.vlgmr.msra.gmra.mrb[4].mxu1 %vm854_vm9, %v843_v59 }
 0x23f   : > { %2410 = vmatpush3.msk.msra.mxu0 %vm833_vm6, %v843_v59  ;;  %2415 = vmatpush3.msk.msra.mxu1 %vm833_vm6, %v843_v59 }
 0x240   : > { %2411 = vmatprep.mubr.msk.f32.mxu0 %vm2951_vm1, %v2952_v10  ;;  %2416 = vmatprep.mubr.msk.f32.mxu1 %vm2951_vm1, %v2952_v10  ;;  %vm1192_vm1 = vcmp.eq.s32.totalorder %v3293_v11, %v3283_v60  ;;  %v2223_v60 = vsel %vm1173_vm0, 1.0, %v2952_v10  ;;  %v2257_v11 = vld [vmem:[%s3191_s16 + $0x58] sm:$0xff] }
 0x241   : > { %2528 = vmatprep.subr.bf16.mxu0 %v2527_v9  ;;  %2536 = vmatprep.subr.bf16.mxu1 %v3426_v4  ;;  %v2226_v34 = vsel %vm1192_vm1, 1.0, %v2952_v10  ;;  %v2559_v10 = vpack.c.bf16 %v2255_v38, %v2254_v5 }
 0x242   : > { %2412 = vmatmul.mubr.msk.f32.vlgmr.msra.gmra.mrb[6].mxu0 %vm854_vm9, %v3333_v39  ;;  %2417 = vmatmul.mubr.msk.f32.vlgmr.msra.gmra.mrb[6].mxu1 %vm854_vm9, %v3343_v41  ;;  %v1202_v37 = vsub.f32 %v2223_v60, %v2226_v34  ;;  %v2563_v39 = vpack.c.bf16 %v2257_v11, %v2256_v16  ;;  %v416_v41 = vpop.xlane.xlu0 %415 }
 0x243   : > { %2530 = vmatpush3.bf16.msra.mxu0 %v2527_v9  ;;  %2538 = vmatpush3.bf16.msra.mxu1 %v3426_v4  ;;  %v426_v49 = vadd.f32 %v419_v43, %v416_v41 }
 0x244   : > { %2532 = vmatprep.subr.bf16.mxu0 %v2531_v22  ;;  %2540 = vmatprep.subr.bf16.mxu1 %v3438_v23 }
 0x245   : > { %2427 = vmatprep.mubr.msk.f32.mxu0 %vm391_vm5, %v3362_v44  ;;  %2441 = vmatprep.mubr.msk.f32.mxu1 %vm391_vm5, %v1232_v56  ;;  %v427_v6 = vadd.f32 %v426_v49, %v422_v47 }
 0x246   : > { %v438_v42 = vpop.xlane.xlu0 %437 }
 0x247   : > { %2534 = vmatpush3.bf16.msra.mxu0 %v2531_v22  ;;  %2542 = vmatpush3.bf16.msra.mxu1 %v3438_v23  ;;  %v448_v1 = vadd.f32 %v441_v45, %v438_v42  ;;  %v428_v13 = vadd.f32 %v427_v6, %v425_v7 }
 0x248   : > { %2544 = vmatprep.subr.bf16.mxu0 %v2543_v31  ;;  %2552 = vmatprep.subr.bf16.mxu1 %v3426_v4 }
 0x249   : > { %v429_v20 = vrot.slane %v428_v13, 4 }
 0x24a   : > { %2428 = vmatmul.mubr.msk.f32.vlgmr.msra.gmra.mrb[8].mxu0 %vm391_vm5, %v1200_v35  ;;  %2442 = vmatmul.mubr.msk.f32.vlgmr.msra.gmra.mrb[8].mxu1 %vm391_vm5, %v1233_v57 }
 0x24b   : > { %2430 = vmatprep.mubr.msk.f32.mxu0 %vm391_vm5, %v1201_v0  ;;  %2444 = vmatprep.mubr.msk.f32.mxu1 %vm391_vm5, %v1234_v17  ;;  %v430_v52 = vadd.f32 %v429_v20, %v428_v13 }
 0x24c   : > { %2546 = vmatpush3.bf16.msra.mxu0 %v2543_v31  ;;  %2554 = vmatpush3.bf16.msra.mxu1 %v3426_v4 }
 0x24d   : > { %2548 = vmatprep.subr.bf16.mxu0 %v2547_v36  ;;  %2556 = vmatprep.subr.bf16.mxu1 %v3438_v23  ;;  %v431_v55 = vrot.slane %v430_v52, 2 }
 0x24e   : > { %2431 = vmatmul.mubr.msk.f32.gmra.mrb[10].mxu0 %vm391_vm5, %v1202_v37  ;;  %2445 = vmatmul.mubr.msk.f32.gmra.mrb[10].mxu1 %vm391_vm5, %v1235_v21 }
 0x24f   : > { %2455 = vmatprep.mubr.msk.f32.mxu0 %vm391_vm5, %v3362_v44  ;;  %2469 = vmatprep.mubr.msk.f32.mxu1 %vm391_vm5, %v2242_v24  ;;  %v432_v58 = vadd.f32 %v431_v55, %v430_v52 }
 0x250   : > { %2550 = vmatpush3.bf16.msra.mxu0 %v2547_v36  ;;  %2558 = vmatpush3.bf16.msra.mxu1 %v3438_v23 }
 0x251   : > { %2560 = vmatprep.subr.bf16.mxu0 %v2559_v10  ;;  %2568 = vmatprep.subr.bf16.mxu1 %v3426_v4 }
 0x253   : > { %2456 = vmatmul.mubr.msk.f32.vlgmr.msra.gmra.mrb[12].mxu0 %vm391_vm5, %v1200_v35  ;;  %2470 = vmatmul.mubr.msk.f32.vlgmr.msra.gmra.mrb[12].mxu1 %vm391_vm5, %v2243_v26 }
 0x254   : > { %2562 = vmatpush3.bf16.msra.mxu0 %v2559_v10  ;;  %2458 = vmatprep.mubr.msk.f32.mxu0 %vm391_vm5, %v1201_v0 }
 0x255   : > { %2472 = vmatprep.mubr.msk.f32.mxu1 %vm391_vm5, %v2244_v32  ;;  %2564 = vmatprep.subr.bf16.mxu0 %v2563_v39 }
 0x256   : > { %2570 = vmatpush3.bf16.msra.mxu1 %v3426_v4  ;;  %v433_v4 = vrot.slane %v432_v58, 1 }
 0x257   : > { %2459 = vmatmul.mubr.msk.f32.gmra.mrb[14].mxu0 %vm391_vm5, %v1202_v37  ;;  %2473 = vmatmul.mubr.msk.f32.gmra.mrb[14].mxu1 %vm391_vm5, %v2245_v33 }
 0x258   : > { %2566 = vmatpush3.bf16.msra.mxu0 %v2563_v39  ;;  %2483 = vmatprep.mubr.msk.f32.mxu0 %vm391_vm5, %v3362_v44  ;;  %v400_v44 = vpop.xlane.xlu0 %399  ;;  %v434_v29 = vadd.f32 %v433_v4, %v432_v58 }
 0x259   : > { %2572 = vmatprep.subr.bf16.mxu1 %v3438_v23  ;;  %2497 = vmatprep.mubr.msk.f32.mxu1 %vm391_vm5, %v2254_v5  ;;  %v405_v2 = vadd.f32 %v404_v15, %v400_v44 }
 0x25a   : > { %2574 = vmatpush3.bf16.msra.mxu1 %v3438_v23  ;;  %v435_v34 = vmul.f32 0.0009765625, %v434_v29 }
 0x25b   : > { %2484 = vmatmul.mubr.msk.f32.vlgmr.msra.gmra.mrb[16].mxu0 %vm391_vm5, %v1200_v35 }
 0x25c   : > { %2486 = vmatprep.mubr.msk.f32.mxu0 %vm391_vm5, %v1201_v0  ;;  %v444_v46 = vpop.xlane.xlu0 %443 }
 0x25d   : > { %2498 = vmatmul.mubr.msk.f32.vlgmr.msra.gmra.mrb[16].mxu1 %vm391_vm5, %v2255_v38  ;;  %v449_v3 = vadd.f32 %v448_v1, %v444_v46 }
 0x25e   : > { %2500 = vmatprep.mubr.msk.f32.mxu1 %vm391_vm5, %v2256_v16 }
 0x25f   : > { %2487 = vmatmul.mubr.msk.f32.gmra.mrb[18].mxu0 %vm391_vm5, %v1202_v37 }
 0x260   : > { %v403_v48 = vpop.xlane.xlu0 %402 }
 0x261   : > { %2501 = vmatmul.mubr.msk.f32.gmra.mrb[18].mxu1 %vm391_vm5, %v2257_v11  ;;  %v406_v12 = vadd.f32 %v405_v2, %v403_v48 }
 0x263   : > { %v407_v19 = vrot.slane %v406_v12, 4 }
 0x264   : > { %v447_v8 = vpop.xlane.xlu0 %446 }
 0x265   : > { %v450_v14 = vadd.f32 %v449_v3, %v447_v8  ;;  %v408_v51 = vadd.f32 %v407_v19, %v406_v12 }
 0x267   : > { %v451_v50 = vrot.slane %v450_v14, 4  ;;  %v409_v54 = vrot.slane %v408_v51, 2 }
 0x269   : > { %v452_v53 = vadd.f32 %v451_v50, %v450_v14  ;;  %v410_v57 = vadd.f32 %v409_v54, %v408_v51 }
 0x26b   : > { %v453_v56 = vrot.slane %v452_v53, 2  ;;  %v411_v63 = vrot.slane %v410_v57, 1 }
 0x26d   : > { %v454_v59 = vadd.f32 %v453_v56, %v452_v53  ;;  %v412_v28 = vadd.f32 %v411_v63, %v410_v57 }
 0x26f   : > { %v455_v9 = vrot.slane %v454_v59, 1  ;;  %v413_v60 = vmul.f32 0.0009765625, %v412_v28 }
 0x271   : > { %v456_v30 = vadd.f32 %v455_v9, %v454_v59  ;;  %v458_v10 = vsub.f32 %v413_v60, %v435_v34 }
 0x273   : > { %v457_v36 = vmul.f32 0.0009765625, %v456_v30  ;;  %v462_v47 = vmul.f32 %v458_v10, %v458_v10 }
 0x275   : > { %v459_v16 = vsub.f32 %v413_v60, %v457_v36  ;;  %v460_v48 = vsub.f32 %v435_v34, %v457_v36 }
 0x277   : > { %v463_v15 = vmul.f32 %v459_v16, %v459_v16  ;;  %v465_v12 = vmul.f32 %v460_v48, %v460_v48 }
 0x279   : > { %v464_v8 = vadd.f32 %v463_v15, %v462_v47 }
 0x27b   : > { %v466_v54 = vadd.f32 %v465_v12, %v464_v8 }
 0x311   : > { %v927_v61 = vpop.f32.mrb[4].mxu0  ;;  %v1001_v62 = vpop.f32.mrb[4].mxu1 }
 0x312   : > { %v1152_v17 = vmul.f32 %v927_v61, %v927_v61  ;;  %v1153_v21 = vmul.f32 %v1001_v62, %v1001_v62  ;;  %v2403_v22 = vpop.f32.mrb[5].mxu0  ;;  %v2408_v23 = vpop.f32.mrb[5].mxu1  ;;  %v461_v61 = vld [vmem:[#allocation11] sm:$0x1] }
 0x313   : > { %v467_v9 = vadd.f32 %v466_v54, %v461_v61 }
 0x314   : > { %v1154_v24 = vadd.f32 %v1153_v21, %v1152_v17 }
 0x315   : > { %v1075_v26 = vpop.f32.mrb[6].mxu0  ;;  %v1147_v27 = vpop.f32.mrb[6].mxu1  ;;  %469 = vst.msk [vmem:[#allocation11] sm:$0x1] %vm468_vm11, %v467_v9 }
 0x316   : > { %v1155_v31 = vmul.f32 %v1075_v26, %v1075_v26  ;;  %v2418_v35 = vpop.f32.mrb[7].mxu1  ;;  %v2413_v32 = vpop.f32.mrb[7].mxu0  ;;  %v1157_v0 = vmul.f32 %v1147_v27, %v1147_v27 }
 0x318   : > { %v1156_v33 = vadd.f32 %v1155_v31, %v1154_v24 }
 0x31a   : > { %v3512_v37 = vadd.f32 %v1157_v0, %v1156_v33 }
 0x31d   : > { %v2429_v5 = vpop.f32.mrb[8].mxu0  ;;  %v2443_v38 = vpop.f32.mrb[8].mxu1 }
 0x31e   : > { %v1431_v11 = vmul.f32 %v2429_v5, %v2429_v5  ;;  %v1458_v39 = vmul.f32 %v2443_v38, %v2443_v38  ;;  %v1411_v40 = vpop.f32.mrb[9].mxu1  ;;  %v1314_v41 = vpop.f32.mrb[9].mxu0 }
 0x31f   : > { %v1430_v25 = vmul.f32 %v1314_v41, %v1314_v41  ;;  %v1457_v42 = vmul.f32 %v1411_v40, %v1411_v40 }
 0x320   : > { %v1464_v43 = vsel %vm391_vm5, %v1458_v39, 0.0  ;;  %v1437_v44 = vsel %vm391_vm5, %v1431_v11, 0.0 }
 0x321   : > { %1465 = vadd.xlane.f32.xlu1 %v1464_v43  ;;  %1438 = vadd.xlane.f32.xlu0 %v1437_v44  ;;  %v2432_v45 = vpop.f32.mrb[10].mxu0  ;;  %v2446_v46 = vpop.f32.mrb[10].mxu1  ;;  %v1434_v3 = vsel %vm391_vm5, %v1430_v25, 0.0  ;;  %v1461_v7 = vsel %vm391_vm5, %v1457_v42, 0.0 }
 0x322   : > { %v1433_v49 = vmul.f32 %v2432_v45, %v2432_v45  ;;  %v1324_v1 = vpop.f32.mrb[11].mxu0  ;;  %v1460_v2 = vmul.f32 %v2446_v46, %v2446_v46  ;;  %v1421_v6 = vpop.f32.mrb[11].mxu1  ;;  %v2208_v45 = vadd.f32 -0.6, %v3401_v18 }
 0x323   : > { %v1459_v13 = vmul.f32 %v1421_v6, %v1421_v6  ;;  %v1432_v53 = vmul.f32 %v1324_v1, %v1324_v1 }
 0x324   : > { %v1443_v14 = vsel %vm391_vm5, %v1433_v49, 0.0  ;;  %v1470_v19 = vsel %vm391_vm5, %v1460_v2, 0.0  ;;  %v828_v15 = vand.u32 2147483647, %v2208_v45 }
 0x325   : > { %1462 = vadd.xlane.f32.xlu1 %v1461_v7  ;;  %1435 = vadd.xlane.f32.xlu0 %v1434_v3  ;;  %v1467_v56 = vsel %vm391_vm5, %v1459_v13, 0.0  ;;  %v1440_v4 = vsel %vm391_vm5, %v1432_v53, 0.0  ;;  %v1159_v7 = vsel %vm829_vm12, %v3512_v37, 0.0 }
 0x326   : > { %v2457_v20 = vpop.f32.mrb[12].mxu0  ;;  %v2471_v50 = vpop.f32.mrb[12].mxu1  ;;  %v830_v6 = vsel %vm829_vm12, %v828_v15, 0.0 }
 0x327   : > { %v1555_v51 = vpop.f32.mrb[13].mxu0  ;;  %v1652_v52 = vpop.f32.mrb[13].mxu1  ;;  %v1672_v55 = vmul.f32 %v2457_v20, %v2457_v20  ;;  %v1699_v17 = vmul.f32 %v2471_v50, %v2471_v50 }
 0x328   : > { %v1671_v57 = vmul.f32 %v1555_v51, %v1555_v51  ;;  %v1698_v21 = vmul.f32 %v1652_v52, %v1652_v52 }
 0x329   : > { %1444 = vadd.xlane.f32.xlu1 %v1443_v14  ;;  %1471 = vadd.xlane.f32.xlu0 %v1470_v19  ;;  %v1678_v22 = vsel %vm391_vm5, %v1672_v55, 0.0  ;;  %v1705_v31 = vsel %vm391_vm5, %v1699_v17, 0.0 }
 0x32a   : > { %v2460_v58 = vpop.f32.mrb[14].mxu0  ;;  %v2474_v59 = vpop.f32.mrb[14].mxu1  ;;  %v1675_v23 = vsel %vm391_vm5, %v1671_v57, 0.0  ;;  %v1702_v35 = vsel %vm391_vm5, %v1698_v21, 0.0 }
 0x32b   : > { %v1662_v62 = vpop.f32.mrb[15].mxu1  ;;  %v1565_v63 = vpop.f32.mrb[15].mxu0  ;;  %v1674_v29 = vmul.f32 %v2460_v58, %v2460_v58  ;;  %v1701_v34 = vmul.f32 %v2474_v59, %v2474_v59 }
 0x32c   : > { %v1700_v30 = vmul.f32 %v1662_v62, %v1662_v62  ;;  %v1673_v39 = vmul.f32 %v1565_v63, %v1565_v63 }
 0x32d   : > { %1468 = vadd.xlane.f32.xlu1 %v1467_v56  ;;  %1441 = vadd.xlane.f32.xlu0 %v1440_v4  ;;  %v1684_v36 = vsel %vm391_vm5, %v1674_v29, 0.0  ;;  %v1711_v16 = vsel %vm391_vm5, %v1701_v34, 0.0 }
 0x32e   : > { %v2485_v24 = vpop.f32.mrb[16].mxu0  ;;  %v1708_v38 = vsel %vm391_vm5, %v1700_v30, 0.0  ;;  %v1681_v42 = vsel %vm391_vm5, %v1673_v39, 0.0 }
 0x32f   : > { %v1796_v26 = vpop.f32.mrb[17].mxu0  ;;  %v1913_v5 = vmul.f32 %v2485_v24, %v2485_v24 }
 0x330   : > { %v2499_v27 = vpop.f32.mrb[16].mxu1  ;;  %v1912_v25 = vmul.f32 %v1796_v26, %v1796_v26 }
 0x331   : > { %1679 = vadd.xlane.f32.xlu1 %v1678_v22  ;;  %1676 = vadd.xlane.f32.xlu0 %v1675_v23  ;;  %v1893_v28 = vpop.f32.mrb[17].mxu1  ;;  %v1940_v10 = vmul.f32 %v2499_v27, %v2499_v27  ;;  %v1919_v11 = vsel %vm391_vm5, %v1913_v5, 0.0 }
 0x332   : > { %v2488_v32 = vpop.f32.mrb[18].mxu0  ;;  %v1939_v46 = vmul.f32 %v1893_v28, %v1893_v28  ;;  %v1916_v47 = vsel %vm391_vm5, %v1912_v25, 0.0 }
 0x333   : > { %v1806_v33 = vpop.f32.mrb[19].mxu0  ;;  %v1946_v41 = vsel %vm391_vm5, %v1940_v10, 0.0  ;;  %v1915_v49 = vmul.f32 %v2488_v32, %v2488_v32 }
 0x334   : > { %v2502_v0 = vpop.f32.mrb[18].mxu1  ;;  %v1914_v40 = vmul.f32 %v1806_v33, %v1806_v33  ;;  %v1943_v1 = vsel %vm391_vm5, %v1939_v46, 0.0 }
 0x335   : > { %1706 = vadd.xlane.f32.xlu1 %v1705_v31  ;;  %1703 = vadd.xlane.f32.xlu0 %v1702_v35  ;;  %v1903_v60 = vpop.f32.mrb[19].mxu1  ;;  %v1942_v2 = vmul.f32 %v2502_v0, %v2502_v0  ;;  %v1925_v3 = vsel %vm391_vm5, %v1915_v49, 0.0 }
 0x336   : > { %v1941_v43 = vmul.f32 %v1903_v60, %v1903_v60  ;;  %v1922_v44 = vsel %vm391_vm5, %v1914_v40, 0.0 }
 0x337   : > { %v1952_v18 = vsel %vm391_vm5, %v1942_v2, 0.0 }
 0x338   : > { %v1949_v48 = vsel %vm391_vm5, %v1941_v43, 0.0 }
 0x339   : > { %1685 = vadd.xlane.f32.xlu1 %v1684_v36  ;;  %1709 = vadd.xlane.f32.xlu0 %v1708_v38 }
 0x33d   : > { %1712 = vadd.xlane.f32.xlu1 %v1711_v16  ;;  %1920 = vadd.xlane.f32.xlu0 %v1919_v11 }
 0x341   : > { %1682 = vadd.xlane.f32.xlu1 %v1681_v42  ;;  %1947 = vadd.xlane.f32.xlu0 %v1946_v41 }
 0x345   : > { %1917 = vadd.xlane.f32.xlu1 %v1916_v47  ;;  %1923 = vadd.xlane.f32.xlu0 %v1922_v44 }
 0x349   : > { %1944 = vadd.xlane.f32.xlu1 %v1943_v1  ;;  %1950 = vadd.xlane.f32.xlu0 %v1949_v48 }
 0x34d   : > { %1926 = vadd.xlane.f32.xlu1 %v1925_v3  ;;  %831 = vadd.xlane.f32.xlu0 %v830_v6 }
 0x351   : > { %1953 = vadd.xlane.f32.xlu1 %v1952_v18 }
 0x355   : > { %1160 = vadd.xlane.f32.xlu1 %v1159_v7 }
 0x3ae   : > { %v1466_v8 = vpop.xlane.xlu1 %1465  ;;  %v1439_v12 = vpop.xlane.xlu0 %1438 }
 0x3b2   : > { %v1463_v13 = vpop.xlane.xlu1 %1462  ;;  %v1436_v14 = vpop.xlane.xlu0 %1435 }
 0x3b3   : > { %v1473_v52 = vadd.f32 %v1466_v8, %v1463_v13  ;;  %v1446_v53 = vadd.f32 %v1439_v12, %v1436_v14 }
 0x3b6   : > { %v1445_v19 = vpop.xlane.xlu1 %1444  ;;  %v1472_v20 = vpop.xlane.xlu0 %1471 }
 0x3ba   : > { %v1469_v50 = vpop.xlane.xlu1 %1468  ;;  %v1442_v51 = vpop.xlane.xlu0 %1441 }
 0x3bb   : > { %v1474_v56 = vadd.f32 %v1473_v52, %v1469_v50  ;;  %v1447_v57 = vadd.f32 %v1446_v53, %v1442_v51 }
 0x3bd   : > { %v1475_v61 = vadd.f32 %v1474_v56, %v1472_v20  ;;  %v1448_v62 = vadd.f32 %v1447_v57, %v1445_v19 }
 0x3be   : > { %v1680_v54 = vpop.xlane.xlu1 %1679  ;;  %v1677_v55 = vpop.xlane.xlu0 %1676 }
 0x3bf   : > { %v1476_v4 = vrot.slane %v1475_v61, 4  ;;  %v1449_v9 = vrot.slane %v1448_v62, 4  ;;  %v1687_v27 = vadd.f32 %v1680_v54, %v1677_v55 }
 0x3c1   : > { %v1477_v24 = vadd.f32 %v1476_v4, %v1475_v61  ;;  %v1450_v26 = vadd.f32 %v1449_v9, %v1448_v62 }
 0x3c2   : > { %v1707_v58 = vpop.xlane.xlu1 %1706  ;;  %v1704_v59 = vpop.xlane.xlu0 %1703 }
 0x3c3   : > { %v1714_v17 = vadd.f32 %v1707_v58, %v1704_v59  ;;  %v1478_v35 = vrot.slane %v1477_v24, 2  ;;  %v1451_v32 = vrot.slane %v1450_v26, 2 }
 0x3c5   : > { %v1479_v5 = vadd.f32 %v1478_v35, %v1477_v24  ;;  %v1452_v38 = vadd.f32 %v1451_v32, %v1450_v26 }
 0x3c6   : > { %v1686_v37 = vpop.xlane.xlu1 %1685  ;;  %v1710_v63 = vpop.xlane.xlu0 %1709 }
 0x3c7   : > { %v1715_v23 = vadd.f32 %v1714_v17, %v1710_v63  ;;  %v1480_v25 = vrot.slane %v1479_v5, 1  ;;  %v1453_v42 = vrot.slane %v1452_v38, 1 }
 0x3c9   : > { %v1481_v2 = vadd.f32 %v1480_v25, %v1479_v5  ;;  %v1454_v6 = vadd.f32 %v1453_v42, %v1452_v38  ;;  %v1151_v38 = vld [vmem:[#allocation12] sm:$0x1]  ;;  %v1975_v25 = vld [vmem:[#allocation11] sm:$0x1] (!%p2266_p2) }
 0x3ca   : > { %v1713_v21 = vpop.xlane.xlu1 %1712  ;;  %v1921_v22 = vpop.xlane.xlu0 %1920 }
 0x3cb   : > { %v1716_v28 = vadd.f32 %v1715_v23, %v1713_v21  ;;  %v1482_v50 = vmul.f32 0.0010080645, %v1481_v2  ;;  %v1455_v52 = vmul.f32 0.0010080645, %v1454_v6  ;;  %v826_v21 = vld [vmem:[#allocation9] sm:$0x1] }
 0x3cd   : > { %v1717_v33 = vrot.slane %v1716_v28, 4  ;;  %v1483_v4 = vadd.f32 %v1482_v50, %v1455_v52 }
 0x3ce   : > { %v1683_v29 = vpop.xlane.xlu1 %1682  ;;  %v1948_v30 = vpop.xlane.xlu0 %1947 }
 0x3cf   : > { %v1688_v31 = vadd.f32 %v1687_v27, %v1683_v29  ;;  %v1718_v10 = vadd.f32 %v1717_v33, %v1716_v28 }
 0x3d1   : > { %v1689_v0 = vadd.f32 %v1688_v31, %v1686_v37  ;;  %v1719_v43 = vrot.slane %v1718_v10, 2 }
 0x3d2   : > { %v1918_v60 = vpop.xlane.xlu1 %1917  ;;  %v1924_v34 = vpop.xlane.xlu0 %1923 }
 0x3d3   : > { %v1690_v36 = vrot.slane %v1689_v0, 4  ;;  %v1928_v11 = vadd.f32 %v1921_v22, %v1918_v60  ;;  %v1720_v18 = vadd.f32 %v1719_v43, %v1718_v10  ;;  %v1966_v10 = vld [vmem:[#allocation14] sm:$0x1] }
 0x3d5   : > { %v1691_v16 = vadd.f32 %v1690_v36, %v1689_v0  ;;  %v1929_v45 = vadd.f32 %v1928_v11, %v1924_v34  ;;  %v1721_v53 = vrot.slane %v1720_v18, 1 }
 0x3d6   : > { %v1945_v39 = vpop.xlane.xlu1 %1944  ;;  %v1951_v40 = vpop.xlane.xlu0 %1950 }
 0x3d7   : > { %v1692_v41 = vrot.slane %v1691_v16, 2  ;;  %v1955_v46 = vadd.f32 %v1948_v30, %v1945_v39  ;;  %v1722_v9 = vadd.f32 %v1721_v53, %v1720_v18 }
 0x3d9   : > { %v1693_v44 = vadd.f32 %v1692_v41, %v1691_v16  ;;  %v1956_v7 = vadd.f32 %v1955_v46, %v1951_v40  ;;  %v1723_v31 = vmul.f32 0.0010080645, %v1722_v9 }
 0x3da   : > { %v1927_v47 = vpop.xlane.xlu1 %1926  ;;  %v832_v48 = vpop.xlane.xlu0 %831 }
 0x3db   : > { %v1694_v15 = vrot.slane %v1693_v44, 1  ;;  %v1930_v49 = vadd.f32 %v1929_v45, %v1927_v47  ;;  %v834_v1 = vsel %vm833_vm6, %v832_v48, 0.0 }
 0x3dc   : > { %v835_v3 = vrot.slane %v834_v1, 4 }
 0x3dd   : > { %v1931_v8 = vrot.slane %v1930_v49, 4  ;;  %v1695_v14 = vadd.f32 %v1694_v15, %v1693_v44  ;;  %v1976_v44 = vmul.f32 (!%p2266_p2), 0.25, %v1975_v25 }
 0x3de   : > { %v836_v12 = vadd.f32 %v835_v3, %v834_v1  ;;  %v1954_v13 = vpop.xlane.xlu1 %1953 }
 0x3df   : > { %v1932_v19 = vadd.f32 %v1931_v8, %v1930_v49  ;;  %v1957_v20 = vadd.f32 %v1956_v7, %v1954_v13  ;;  %v1696_v58 = vmul.f32 0.0010080645, %v1695_v14  ;;  %1982 = vst.msk [vmem:[#allocation11] sm:$0x1] (!%p2266_p2), %vm468_vm11, %v1976_v44 }
 0x3e0   : > { %v837_v51 = vrot.slane %v836_v12, 2 }
 0x3e1   : > { %v1933_v54 = vrot.slane %v1932_v19, 2  ;;  %v1958_v55 = vrot.slane %v1957_v20, 4  ;;  %v1697_v26 = vadd.f32 %v1696_v58, %v1483_v4 }
 0x3e2   : > { %v838_v56 = vadd.f32 %v837_v51, %v836_v12  ;;  %v1161_v57 = vpop.xlane.xlu1 %1160 }
 0x3e3   : > { %v1934_v59 = vadd.f32 %v1933_v54, %v1932_v19  ;;  %v1959_v61 = vadd.f32 %v1958_v55, %v1957_v20  ;;  %v1162_v62 = vsel %vm833_vm6, %v1161_v57, 0.0  ;;  %v1724_v0 = vadd.f32 %v1723_v31, %v1697_v26 }
 0x3e4   : > { %v839_v37 = vrot.slane %v838_v56, 1  ;;  %v1163_v63 = vrot.slane %v1162_v62, 4 }
 0x3e5   : > { %v1935_v17 = vrot.slane %v1934_v59, 1  ;;  %v1960_v22 = vrot.slane %v1959_v61, 2 }
 0x3e6   : > { %v840_v23 = vadd.f32 %v839_v37, %v838_v56  ;;  %v1164_v24 = vadd.f32 %v1163_v63, %v1162_v62 }
 0x3e7   : > { %v1936_v27 = vadd.f32 %v1935_v17, %v1934_v59  ;;  %v1961_v28 = vadd.f32 %v1960_v22, %v1959_v61 }
 0x3e8   : > { %v841_v29 = vadd.f32 %v840_v23, %v826_v21  ;;  %v1165_v30 = vrot.slane %v1164_v24, 2 }
 0x3e9   : > { %v1937_v35 = vmul.f32 0.0010080645, %v1936_v27  ;;  %v1962_v32 = vrot.slane %v1961_v28, 1 }
 0x3ea   : > { %842 = vst.msk [vmem:[#allocation9] sm:$0x1] %vm468_vm11, %v841_v29  ;;  %v1166_v33 = vadd.f32 %v1165_v30, %v1164_v24 }
 0x3eb   : > { %v1963_v60 = vadd.f32 %v1962_v32, %v1961_v28  ;;  %v1938_v36 = vadd.f32 %v1937_v35, %v1724_v0 }
 0x3ec   : > { %v1167_v34 = vrot.slane %v1166_v33, 1 }
 0x3ed   : > { %v1964_v5 = vmul.f32 0.0010080645, %v1963_v60  ;;  %1972 = sbr.rel (%p2266_p2) target bundleno = 1027 (0x403), region = 52 }
 0x3ee   : > { %v1168_v16 = vadd.f32 %v1167_v34, %v1166_v33 }
 0x3ef   : > { %v1965_v11 = vadd.f32 %v1964_v5, %v1938_v36 }
 0x3f0   : > { %v1169_v39 = vadd.f32 %v1168_v16, %v1151_v38 }
 0x3f1   : > { %v1967_v40 = vadd.f32 %v1966_v10, %v1965_v11  ;;  %v1973_v41 = vld [vmem:[#allocation9] sm:$0x1] (!%p2266_p2) }
 0x3f2   : > { %1170 = vst.msk [vmem:[#allocation12] sm:$0x1] %vm468_vm11, %v1169_v39  ;;  %v1974_v43 = vmul.f32 (!%p2266_p2), 0.125, %v1973_v41 }
 0x3f3   : > { %1968 = vst.msk [vmem:[#allocation14] sm:$0x1] %vm468_vm11, %v1967_v40 }
 0x3f4   : > { %1981 = vst.msk [vmem:[#allocation9] sm:$0x1] %vm468_vm11, %v1974_v43 }
 0x3f9   : > { %v1977_v42 = vld [vmem:[#allocation12] sm:$0x1] }
 0x3fa   : > { %v1978_v45 = vmul.f32 0.125, %v1977_v42  ;;  %v1979_v46 = vld [vmem:[#allocation14] sm:$0x1] }
 0x3fb   : > { %v1980_v47 = vmul.f32 10.0, %v1979_v46 }
 0x3fc   : > { %1983 = vst.msk [vmem:[#allocation12] sm:$0x1] %vm468_vm11, %v1978_v45  ;;  %v1985_v48 = vadd.f32 %v1978_v45, %v1974_v43 }
 0x3fd   : > { %1984 = vst.msk [vmem:[#allocation14] sm:$0x1] %vm468_vm11, %v1980_v47 }
 0x3fe   : > { %v1986_v15 = vadd.f32 %v1985_v48, %v1976_v44 }
 0x400   : > { %v1987_v49 = vadd.f32 %v1986_v15, %v1980_v47 }
 0x402   : > { %1988 = vst.msk [vmem:[#allocation8] sm:$0x1] %vm468_vm11, %v1987_v49 }
 0x403 PF: > { %p2619_p7 = scmp.eq.s32.totalorder %s3017_s28, 1  ;;  %s2953_s10 = smov [#allocation9]  }
 0x404   : > { %s2007_s27 = sshll.u32 %s2953_s10, 4  ;;  %s2954_s1 = smov [#allocation12]   ;;  %s2008_s27 = int_to_ptr.vmem [resolvable:$true] %s2007_s27 }
 0x405   : > { %s2029_s8 = sshll.u32 %s2954_s1, 4  ;;  %s2762_s17 = scalar_lea.vmem %s2008_s27, 16  ;;  %s2030_s8 = int_to_ptr.vmem [resolvable:$true] %s2029_s8 }
 0x406   : > { %p2763_p9 = scmp.ne.s32.totalorder %s2008_s27, %s2762_s17  ;;  %s2768_s14 = scalar_lea.vmem %s2008_s27, 32 }
 0x407   : > { %p2769_p5 = scmp.lt.s32.totalorder %s2008_s27, %s2008_s27  ;;  %p2770_p6 = scmp.lt.s32.totalorder %s2768_s14, %s2762_s17 }
 0x408   : > { %p2764_p0 = pnand %p2763_p9, %p2619_p7 }
 0x409   : > { %p2771_p10 = por %p2770_p6, %p2769_p5 }
 0x40a   : > { %p2765_p3 = pneg %p2764_p0 }
 0x40c   : > { %p2772_p4 = pnand %p2771_p10, %p2765_p3 }
 0x40e   : > { %2775 = shalt.err (!%p2772_p4)
}
 0x40f   : > { %s2776_s12 = scalar_lea.hbm %s3672_s4, 16 }
 0x410   : > { %p2777_p13 = scmp.ne.s32.totalorder %s3672_s4, %s2776_s12  ;;  %p2782_p11 = scmp.lt.u32.totalorder %s2776_s12, %s3672_s4 }
 0x412   : > { %p2778_p1 = pnand %p2777_p13, %p2619_p7 }
 0x414   : > { %p2779_p12 = pneg %p2778_p1 }
 0x416   : > { %p2784_p8 = pnand %p2782_p11, %p2779_p12 }
 0x418   : > { %2787 = shalt.err (!%p2784_p8)
}
 0x419   : > { %2591 = dma.vmem_to_hbm [thread:$0]  (%p2619_p7), %s2008_s27, 16, %s3672_s4, [#allocation10]  }
 0x41a   : > { %s2788_s24 = scalar_lea.vmem %s2030_s8, 16  ;;  %s2794_s13 = scalar_lea.vmem %s2030_s8, 32 }
 0x41b   : > { %p2789_p2 = scmp.ne.s32.totalorder %s2030_s8, %s2788_s24  ;;  %p2795_p3 = scmp.lt.s32.totalorder %s2030_s8, %s2030_s8 }
 0x41c   : > { %p2796_p5 = scmp.lt.s32.totalorder %s2794_s13, %s2788_s24 }
 0x41d   : > { %p2790_p9 = pnand %p2789_p2, %p2619_p7 }
 0x41e   : > { %p2797_p6 = por %p2796_p5, %p2795_p3 }
 0x41f   : > { %p2791_p0 = pneg %p2790_p9 }
 0x421   : > { %p2798_p10 = pnand %p2797_p6, %p2791_p0 }
 0x423   : > { %2801 = shalt.err (!%p2798_p10)
}
 0x424   : > { %s2802_s16 = scalar_lea.hbm %s3674_s6, 16 }
 0x425   : > { %p2803_p4 = scmp.ne.s32.totalorder %s3674_s6, %s2802_s16  ;;  %p2808_p12 = scmp.lt.u32.totalorder %s2802_s16, %s3674_s6 }
 0x427   : > { %p2804_p13 = pnand %p2803_p4, %p2619_p7 }
 0x429   : > { %p2805_p1 = pneg %p2804_p13 }
 0x42b   : > { %p2810_p11 = pnand %p2808_p12, %p2805_p1 }
 0x42d   : > { %2813 = shalt.err (!%p2810_p11)
}
 0x42e   : > { %2595 = dma.vmem_to_hbm [thread:$0]  (%p2619_p7), %s2030_s8, 16, %s3674_s6, [#allocation13]  }
 0x42f   : > { %s2955_s9 = smov [#allocation8]   ;;  %s2956_s22 = smov [#allocation11]  }
 0x430   : > { %s1996_s12 = sshll.u32 %s2955_s9, 4  ;;  %s2018_s19 = sshll.u32 %s2956_s22, 4  ;;  %s1997_s12 = int_to_ptr.vmem [resolvable:$true] %s1996_s12  ;;  %s2019_s19 = int_to_ptr.vmem [resolvable:$true] %s2018_s19 }
 0x431   : > { %s2814_s30 = scalar_lea.vmem %s1997_s12, 16  ;;  %s2820_s23 = scalar_lea.vmem %s1997_s12, 32 }
 0x432   : > { %p2815_p8 = scmp.ne.s32.totalorder %s1997_s12, %s2814_s30  ;;  %p2821_p0 = scmp.lt.s32.totalorder %s1997_s12, %s1997_s12 }
 0x433   : > { %p2822_p3 = scmp.lt.s32.totalorder %s2820_s23, %s2814_s30 }
 0x434   : > { %p2816_p2 = pnand %p2815_p8, %p2619_p7 }
 0x435   : > { %p2823_p5 = por %p2822_p3, %p2821_p0 }
 0x436   : > { %p2817_p9 = pneg %p2816_p2 }
 0x438   : > { %p2824_p6 = pnand %p2823_p5, %p2817_p9 }
 0x43a   : > { %2827 = shalt.err (!%p2824_p6)
}
 0x43b   : > { %s2828_s8 = scalar_lea.hbm %s3671_s3, 16 }
 0x43c   : > { %p2829_p10 = scmp.ne.s32.totalorder %s3671_s3, %s2828_s8  ;;  %p2834_p1 = scmp.lt.u32.totalorder %s2828_s8, %s3671_s3 }
 0x43e   : > { %p2830_p4 = pnand %p2829_p10, %p2619_p7 }
 0x440   : > { %p2831_p13 = pneg %p2830_p4 }
 0x442   : > { %p2836_p12 = pnand %p2834_p1, %p2831_p13 }
 0x444   : > { %2839 = shalt.err (!%p2836_p12)
}
 0x445   : > { %2589 = dma.vmem_to_hbm [thread:$0]  (%p2619_p7), %s1997_s12, 16, %s3671_s3, [#allocation4]  }
 0x446   : > { %s2840_s1 = scalar_lea.vmem %s2019_s19, 16  ;;  %s2846_s27 = scalar_lea.vmem %s2019_s19, 32 }
 0x447   : > { %p2841_p11 = scmp.ne.s32.totalorder %s2019_s19, %s2840_s1  ;;  %p2847_p9 = scmp.lt.s32.totalorder %s2019_s19, %s2019_s19 }
 0x448   : > { %p2848_p0 = scmp.lt.s32.totalorder %s2846_s27, %s2840_s1 }
 0x449   : > { %p2842_p8 = pnand %p2841_p11, %p2619_p7 }
 0x44a   : > { %p2849_p3 = por %p2848_p0, %p2847_p9 }
 0x44b   : > { %p2843_p2 = pneg %p2842_p8 }
 0x44d   : > { %p2850_p5 = pnand %p2849_p3, %p2843_p2 }
 0x44f   : > { %2853 = shalt.err (!%p2850_p5)
}
 0x450   : > { %s2854_s18 = scalar_lea.hbm %s3673_s5, 16 }
 0x451   : > { %p2855_p6 = scmp.ne.s32.totalorder %s3673_s5, %s2854_s18  ;;  %p2860_p13 = scmp.lt.u32.totalorder %s2854_s18, %s3673_s5 }
 0x453   : > { %p2856_p10 = pnand %p2855_p6, %p2619_p7 }
 0x455   : > { %p2857_p4 = pneg %p2856_p10 }
 0x457   : > { %p2862_p1 = pnand %p2860_p13, %p2857_p4 }
 0x459   : > { %2865 = shalt.err (!%p2862_p1)
}
 0x45a   : > { %2593 = dma.vmem_to_hbm [thread:$0]  (%p2619_p7), %s2019_s19, 16, %s3673_s5, [#allocation10]  }
 0x45b   : > { %s2957_s15 = smov [#allocation14]  }
 0x45c   : > { %s2040_s8 = sshll.u32 %s2957_s15, 4  ;;  %s2041_s8 = int_to_ptr.vmem [resolvable:$true] %s2040_s8 }
 0x45d   : > { %s2866_s24 = scalar_lea.vmem %s2041_s8, 16  ;;  %s2872_s13 = scalar_lea.vmem %s2041_s8, 32 }
 0x45e   : > { %p2867_p12 = scmp.ne.s32.totalorder %s2041_s8, %s2866_s24  ;;  %p2873_p2 = scmp.lt.s32.totalorder %s2041_s8, %s2041_s8 }
 0x45f   : > { %p2874_p9 = scmp.lt.s32.totalorder %s2872_s13, %s2866_s24 }
 0x460   : > { %p2868_p11 = pnand %p2867_p12, %p2619_p7 }
 0x461   : > { %p2875_p0 = por %p2874_p9, %p2873_p2 }
 0x462   : > { %p2869_p8 = pneg %p2868_p11 }
 0x464   : > { %p2876_p3 = pnand %p2875_p0, %p2869_p8 }
 0x466   : > { %2879 = shalt.err (!%p2876_p3)
}
 0x467   : > { %s2880_s16 = scalar_lea.hbm %s3675_s7, 16 }
 0x468   : > { %p2881_p5 = scmp.ne.s32.totalorder %s3675_s7, %s2880_s16  ;;  %p2886_p4 = scmp.lt.u32.totalorder %s2880_s16, %s3675_s7 }
 0x46a   : > { %p2882_p6 = pnand %p2881_p5, %p2619_p7 }
 0x46c   : > { %p2883_p10 = pneg %p2882_p6 }
 0x46e   : > { %p2888_p13 = pnand %p2886_p4, %p2883_p10 }
 0x470   : > { %2891 = shalt.err (!%p2888_p13)
}
 0x471   : > { %2597 = dma.vmem_to_hbm [thread:$0]  (%p2619_p7), %s2041_s8, 16, %s3675_s7, [#allocation13]  }
 0x472   : > { %2917 = dma.done.wait (%p2619_p7), [#allocation4], 16  }
 0x473   : > { %2919 = vsyncadd (%p2619_p7), [#allocation4], 4294967280 }
 0x474   : > { %2921 = dma.done.wait (%p2619_p7), [#allocation10], 32  }
 0x475   : > { %2923 = vsyncadd (%p2619_p7), [#allocation10], 4294967264 }
 0x476   : > { %2925 = dma.done.wait (%p2619_p7), [#allocation13], 32  }
 0x477   : > { %2927 = vsyncadd (%p2619_p7), [#allocation13], 4294967264 }
 0x478 PF: > { %s3696_s18 = sld [smem:[#allocation20_spill]]  ;;  %p24_p1 = scmp.ge.s32.totalorder %s3020_s29, 4  }
 0x479   : > { %s3697_s24 = smov %s2934_s25  ;;  %s3698_s25 = smov %s2938_s26 }
 0x47a   : > { %s3700_s27 = smov %s3020_s29  ;;  %26 = sbr.rel (!%p24_p1) target bundleno = 10 (0xa), region = 139 }
 0x47e   : > { %s3699_s26 = smov %s3696_s18 }
 0x481   :  { %2069 = vsyncpa [#allocation3], 1 }
 0x482   :  { %2071 = vsyncpa [#allocation3 + $0x1], 1 }
 0x483   :  { %2072 = vsyncpa [#allocation6], 1 }
 0x484   :  { %2074 = vsyncpa [#allocation6 + $0x1], 1 }
 0x485   :  { %2075 = vsyncpa [#allocation4], 1 }
 0x486   :  { %2077 = vsyncpa [#allocation4 + $0x1], 1 }
 0x487   :  { %2078 = vsyncpa [#allocation10], 1 }
 0x488   :  { %2079 = vsyncpa [#allocation13], 1 }

</bundles_post_ra>
